<compile_context>
chip_gen: v5e
topology: v5e:2x2
jax: 0.10.0
libtpu: 0.0.40
codegen_flags: <defaults>
</compile_context>

<pallas_src>
import functools

import jax
import jax.numpy as jnp
from jax.experimental import pallas as pl
from jax.experimental.pallas import tpu as pltpu

# ---- "config" (small synthetic LlamaConfig) -------------------------------
HIDDEN = 128
NUM_HEADS = 4
NUM_KV_HEADS = 2
HEAD_DIM = HIDDEN // NUM_HEADS          # 32
INTERMEDIATE = 256
Q_SIZE = NUM_HEADS * HEAD_DIM           # 128
KV_SIZE = NUM_KV_HEADS * HEAD_DIM       # 64
RMS_EPS = 1e-5
ROPE_THETA = 10000.0
T = 8                                   # sequence length

COMPUTE_DTYPE = jnp.bfloat16            # MXU operand dtype (accumulation stays f32)


# ---- fused decoder-layer kernel --------------------------------------------
def decoder_layer_kernel(*refs, has_residual: bool):
    if has_residual:
        (x_ref, res_ref, cos_ref, sin_ref, ln_in_ref, ln_post_ref,
         w_qkv_ref, w_o_ref, w_gu_ref, w_down_ref, out_ref, res_out_ref) = refs
    else:
        (x_ref, cos_ref, sin_ref, ln_in_ref, ln_post_ref,
         w_qkv_ref, w_o_ref, w_gu_ref, w_down_ref, out_ref, res_out_ref) = refs
        res_ref = None

    t = x_ref.shape[0]
    d = HEAD_DIM
    d2 = d // 2
    group = NUM_HEADS // NUM_KV_HEADS

    # ---- (optional residual add) + input RMSNorm, all f32 -------------------
    x = x_ref[...].astype(jnp.float32)
    z1 = x + res_ref[...].astype(jnp.float32) if has_residual else x
    var1 = jnp.mean(z1 * z1, axis=-1, keepdims=True)
    h1 = z1 * jax.lax.rsqrt(var1 + RMS_EPS) * ln_in_ref[...].astype(jnp.float32)

    # ---- fused QKV projection: [T,H] @ [H, Q+2KV]  (Q cols pre-scaled) ------
    qkv = jnp.dot(h1.astype(COMPUTE_DTYPE), w_qkv_ref[...],
                  preferred_element_type=jnp.float32)            # [T, Q+2KV] f32
    q = qkv[:, :Q_SIZE]                                          # [T, NH*D]
    k = qkv[:, Q_SIZE:Q_SIZE + KV_SIZE]                          # [T, NKV*D]
    v = qkv[:, Q_SIZE + KV_SIZE:]                                # [T, NKV*D]

    cos_full = cos_ref[...]      # [T, D]   (cos duplicated across the two halves)
    sin_signed = sin_ref[...]    # [T, D]   ([-sin, sin])

    def rope(xh):  # full-width roll-based rotate-half on one head slab [T, D]
        return xh * cos_full + pltpu.roll(xh, shift=d2, axis=1) * sin_signed

    # Causal mask for the group-stacked score matrix, built once (no concatenates).
    row = jax.lax.broadcasted_iota(jnp.int32, (group * t, t), 0)
    col = jax.lax.broadcasted_iota(jnp.int32, (group * t, t), 1)
    causal_g = (row % t) >= col                                  # [group*T, T]

    # ---- GQA causal attention with per-head accumulated O projection --------
    attn_out = jnp.zeros((t, HIDDEN), jnp.float32)
    for kvh in range(NUM_KV_HEADS):                              # static unroll (small)
        kh = rope(k[:, kvh * d:(kvh + 1) * d]).astype(COMPUTE_DTYPE)   # [T, D]
        vh = v[:, kvh * d:(kvh + 1) * d].astype(COMPUTE_DTYPE)         # [T, D]
        # Stack the group's Q heads along sublanes -> one bigger MXU push.
        q_grp = jnp.concatenate(
            [rope(q[:, (kvh * group + g) * d:(kvh * group + g + 1) * d])
             for g in range(group)], axis=0).astype(COMPUTE_DTYPE)     # [group*T, D]
        # QK^T without materializing kh.T (contract last dims); bf16 operands.
        s = jax.lax.dot_general(q_grp, kh, (((1,), (1,)), ((), ())),
                                preferred_element_type=jnp.float32)    # [group*T, T]
        s = jnp.where(causal_g, s, -1e30)
        m = jnp.max(s, axis=-1, keepdims=True)
        p = jnp.exp(s - m)
        p = p * pl.reciprocal(jnp.sum(p, axis=-1, keepdims=True), approx=True)
        o_grp = jnp.dot(p.astype(COMPUTE_DTYPE), vh,
                        preferred_element_type=jnp.float32)            # [group*T, D]
        # O projection accumulated per head (no [T, NH*D] lane concatenate).
        for g in range(group):
            h = kvh * group + g
            attn_out = attn_out + jnp.dot(
                o_grp[g * t:(g + 1) * t, :].astype(COMPUTE_DTYPE),
                w_o_ref[h * d:(h + 1) * d, :],
                preferred_element_type=jnp.float32)                    # [T, H]

    # ---- post-attention residual add + RMSNorm (f32) -------------------------
    z2 = attn_out + z1
    res_out_ref[...] = z2.astype(res_out_ref.dtype)
    var2 = jnp.mean(z2 * z2, axis=-1, keepdims=True)
    h2 = z2 * jax.lax.rsqrt(var2 + RMS_EPS) * ln_post_ref[...].astype(jnp.float32)

    # ---- MLP: fused gate/up matmul, SiLU*mul (f32), down proj ----------------
    gu = jnp.dot(h2.astype(COMPUTE_DTYPE), w_gu_ref[...],
                 preferred_element_type=jnp.float32)             # [T, 2*I]
    g_act = gu[:, :INTERMEDIATE]
    u_act = gu[:, INTERMEDIATE:]
    act = (g_act * jax.nn.sigmoid(g_act)) * u_act                # SiluAndMul, f32
    out = jnp.dot(act.astype(COMPUTE_DTYPE), w_down_ref[...],
                  preferred_element_type=jnp.float32)            # [T, H]
    out_ref[...] = out.astype(out_ref.dtype)


# ---- pallas_call plumbing (single full-array VMEM block) --------------------
def _full_spec(shape):
    n = len(shape)
    return pl.BlockSpec(shape, lambda i, _n=n: (0,) * _n)


def _fused_layer_call(args, t, dtype, has_residual, aliases):
    kern = functools.partial(decoder_layer_kernel, has_residual=has_residual)
    hs = jax.ShapeDtypeStruct((t, HIDDEN), dtype)
    return pl.pallas_call(
        kern,
        grid=(1,),
        in_specs=[_full_spec(a.shape) for a in args],
        out_specs=(_full_spec((t, HIDDEN)), _full_spec((t, HIDDEN))),
        out_shape=(hs, hs),
        input_output_aliases=aliases,
        compiler_params=pltpu.CompilerParams(
            dimension_semantics=("arbitrary",)),
    )(*args)


# ---- parameters (deterministic synthetic init, pre-transposed [in, out]) ----
def init_params(key):
    ks = jax.random.split(key, 5)
    s = 0.02
    w_qkv = jax.random.normal(ks[0], (HIDDEN, Q_SIZE + 2 * KV_SIZE), jnp.float32) * s
    # Fold the attention score scale (1/sqrt(head_dim)) into the Q columns.
    w_qkv = w_qkv.at[:, :Q_SIZE].multiply(HEAD_DIM ** -0.5)
    w_o = jax.random.normal(ks[1], (Q_SIZE, HIDDEN), jnp.float32) * s
    w_gate = jax.random.normal(ks[2], (HIDDEN, INTERMEDIATE), jnp.float32) * s
    w_up = jax.random.normal(ks[3], (HIDDEN, INTERMEDIATE), jnp.float32) * s
    w_down = jax.random.normal(ks[4], (INTERMEDIATE, HIDDEN), jnp.float32) * s
    return {
        "input_ln_w": jnp.ones((1, HIDDEN), jnp.float32),
        "post_ln_w": jnp.ones((1, HIDDEN), jnp.float32),
        # [in, out] layout; stored bf16 (halves weight DMA, MXU-native operands).
        "w_qkv": w_qkv.astype(COMPUTE_DTYPE),
        "w_o": w_o.astype(COMPUTE_DTYPE),
        "w_gate_up": jnp.concatenate([w_gate, w_up], axis=-1).astype(COMPUTE_DTYPE),
        "w_down": w_down.astype(COMPUTE_DTYPE),
    }


# ---- forward pass -----------------------------------------------------------
def llama_decoder_layer(positions, hidden_states, params, residual=None,
                        kv_cache=None, input_metadata=None):
    """Mirrors LlamaDecoderLayer.forward -> (hidden_states, residual)."""
    # TODO(synk): kv_cache / input_metadata (paged KV cache) ignored; prefill path only.
    t = hidden_states.shape[0]

    # Rotary tables (analogue of vLLM's precomputed cos_sin_cache), prepared for the
    # roll-based in-kernel RoPE: cos duplicated, sin pre-signed as [-sin, sin].
    inv_freq = 1.0 / (ROPE_THETA ** (jnp.arange(0, HEAD_DIM, 2, dtype=jnp.float32)
                                     / HEAD_DIM))
    ang = positions.astype(jnp.float32)[:, None] * inv_freq[None, :]      # [T, D/2]
    cos_h, sin_h = jnp.cos(ang), jnp.sin(ang)
    cos_full = jnp.concatenate([cos_h, cos_h], axis=-1)                   # [T, D]
    sin_signed = jnp.concatenate([-sin_h, sin_h], axis=-1)                # [T, D]

    common = (cos_full, sin_signed,
              params["input_ln_w"], params["post_ln_w"],
              params["w_qkv"], params["w_o"], params["w_gate_up"], params["w_down"])

    if residual is None:
        # "residual is None" branch: residual := hidden_states (no zero array / DMA).
        args = (hidden_states,) + common
        aliases = {0: 0}                       # hidden_states buffer -> out
        has_res = False
    else:
        args = (hidden_states, residual) + common
        aliases = {0: 0, 1: 1}                 # hidden_states -> out, residual -> res_out
        has_res = True

    return _fused_layer_call(args, t, hidden_states.dtype, has_res, aliases)


# ---- pure-JAX reference (same bf16 weights, f32 math) for a sanity check ----
def _reference(positions, hidden_states, params, residual=None):
    x = hidden_states.astype(jnp.float32)
    z1 = x if residual is None else x + residual.astype(jnp.float32)

    def rms(z, w):
        var = jnp.mean(z * z, axis=-1, keepdims=True)
        return z * jax.lax.rsqrt(var + RMS_EPS) * w.astype(jnp.float32)

    h1 = rms(z1, params["input_ln_w"])
    qkv = h1 @ params["w_qkv"].astype(jnp.float32)    # Q columns already carry 1/sqrt(d)
    q = qkv[:, :Q_SIZE]
    k = qkv[:, Q_SIZE:Q_SIZE + KV_SIZE]
    v = qkv[:, Q_SIZE + KV_SIZE:]

    t = x.shape[0]
    d2 = HEAD_DIM // 2
    inv_freq = 1.0 / (ROPE_THETA ** (jnp.arange(0, HEAD_DIM, 2, dtype=jnp.float32)
                                     / HEAD_DIM))
    ang = positions.astype(jnp.float32)[:, None] * inv_freq[None, :]
    cos, sin = jnp.cos(ang), jnp.sin(ang)

    def rope(xh):
        x1, x2 = xh[:, :d2], xh[:, d2:]
        return jnp.concatenate([x1 * cos - x2 * sin, x2 * cos + x1 * sin], axis=-1)

    causal = jnp.tril(jnp.ones((t, t), bool))
    group = NUM_HEADS // NUM_KV_HEADS
    heads = []
    for h in range(NUM_HEADS):
        kv = h // group
        qh = rope(q[:, h * HEAD_DIM:(h + 1) * HEAD_DIM])
        kh = rope(k[:, kv * HEAD_DIM:(kv + 1) * HEAD_DIM])
        vh = v[:, kv * HEAD_DIM:(kv + 1) * HEAD_DIM]
        s = qh @ kh.T                                  # scale folded into w_qkv
        s = jnp.where(causal, s, -1e30)
        heads.append(jax.nn.softmax(s, axis=-1) @ vh)
    attn = jnp.concatenate(heads, axis=-1)
    attn_out = attn @ params["w_o"].astype(jnp.float32)
    z2 = attn_out + z1
    h2 = rms(z2, params["post_ln_w"])
    gu = h2 @ params["w_gate_up"].astype(jnp.float32)
    g, u = gu[:, :INTERMEDIATE], gu[:, INTERMEDIATE:]
    out = (g * jax.nn.sigmoid(g) * u) @ params["w_down"].astype(jnp.float32)
    return out, z2


if __name__ == "__main__":
    key = jax.random.PRNGKey(0)
    pkey, xkey = jax.random.split(key)
    params = init_params(pkey)

    hidden_states = jax.random.normal(xkey, (T, HIDDEN), jnp.float32)
    positions = jnp.arange(T, dtype=jnp.int32)

    layer = jax.jit(llama_decoder_layer)

    # First layer: residual is None (vLLM's first-layer branch).
    out1, res1 = layer(positions, hidden_states, params)
    # Second (chained) layer: residual path, as in a stacked model.
    out2, res2 = layer(positions, out1, params, res1)
    jax.block_until_ready((out1, res1, out2, res2))

    assert out1.shape == (T, HIDDEN) and res1.shape == (T, HIDDEN)
    assert out2.shape == (T, HIDDEN) and res2.shape == (T, HIDDEN)

    r_out1, r_res1 = _reference(positions, hidden_states, params)
    assert bool(jnp.allclose(out1, r_out1, atol=2e-2, rtol=2e-2))
    assert bool(jnp.allclose(res1, r_res1, atol=2e-2, rtol=2e-2))

    # Per-layer check of the residual path (feed the kernel's own layer-1 outputs).
    r_out2, r_res2 = _reference(positions, out1, params, res1)
    assert bool(jnp.allclose(out2, r_out2, atol=2e-2, rtol=2e-2))
    assert bool(jnp.allclose(res2, r_res2, atol=2e-2, rtol=2e-2))

    print("KERNEL_OK")
</pallas_src>

<mosaic_0001>
module attributes {stable_mosaic.version = 11 : i64} {
  func.func @decoder_layer_kernel(%arg0: i32, %arg1: memref<8x128xf32, #tpu.memory_space<vmem>>, %arg2: memref<8x32xf32, #tpu.memory_space<vmem>>, %arg3: memref<8x32xf32, #tpu.memory_space<vmem>>, %arg4: memref<1x128xf32, #tpu.memory_space<vmem>>, %arg5: memref<1x128xf32, #tpu.memory_space<vmem>>, %arg6: memref<128x256xbf16, #tpu.memory_space<vmem>>, %arg7: memref<128x128xbf16, #tpu.memory_space<vmem>>, %arg8: memref<128x512xbf16, #tpu.memory_space<vmem>>, %arg9: memref<256x128xbf16, #tpu.memory_space<vmem>>, %arg10: memref<8x128xf32, #tpu.memory_space<vmem>>, %arg11: memref<8x128xf32, #tpu.memory_space<vmem>>) attributes {dimension_semantics = [#tpu.dimension_semantics<arbitrary>], iteration_bounds = array<i64: 1>, scalar_prefetch = 0 : i64, scratch_operands = 0 : i64, tpu.core_type = #tpu.core_type<tc>, window_params = [{pipeline_mode = #tpu.pipeline_mode<synchronous>, transform_indices = @transform_0, window_bounds = array<i64: 8, 128>}, {pipeline_mode = #tpu.pipeline_mode<synchronous>, transform_indices = @transform_1, window_bounds = array<i64: 8, 32>}, {pipeline_mode = #tpu.pipeline_mode<synchronous>, transform_indices = @transform_2, window_bounds = array<i64: 8, 32>}, {pipeline_mode = #tpu.pipeline_mode<synchronous>, transform_indices = @transform_3, window_bounds = array<i64: 1, 128>}, {pipeline_mode = #tpu.pipeline_mode<synchronous>, transform_indices = @transform_4, window_bounds = array<i64: 1, 128>}, {pipeline_mode = #tpu.pipeline_mode<synchronous>, transform_indices = @transform_5, window_bounds = array<i64: 128, 256>}, {pipeline_mode = #tpu.pipeline_mode<synchronous>, transform_indices = @transform_6, window_bounds = array<i64: 128, 128>}, {pipeline_mode = #tpu.pipeline_mode<synchronous>, transform_indices = @transform_7, window_bounds = array<i64: 128, 512>}, {pipeline_mode = #tpu.pipeline_mode<synchronous>, transform_indices = @transform_8, window_bounds = array<i64: 256, 128>}, {pipeline_mode = #tpu.pipeline_mode<synchronous>, transform_indices = @transform_9, window_bounds = array<i64: 8, 128>}, {pipeline_mode = #tpu.pipeline_mode<synchronous>, transform_indices = @transform_10, window_bounds = array<i64: 8, 128>}]} {
    %c0 = arith.constant 0 : index
    %c0_0 = arith.constant 0 : index
    %0 = vector.load %arg1[%c0, %c0_0] : memref<8x128xf32, #tpu.memory_space<vmem>>, vector<8x128xf32>
    %1 = arith.mulf %0, %0 : vector<8x128xf32>
    %cst = arith.constant dense<0.000000e+00> : vector<8xf32>
    %2 = vector.multi_reduction <add>, %1, %cst [1] : vector<8x128xf32> to vector<8xf32>
    %3 = vector.shape_cast %2 : vector<8xf32> to vector<8x1xf32>
    %cst_1 = arith.constant 1.280000e+02 : f32
    %4 = vector.broadcast %cst_1 : f32 to vector<8x1xf32>
    %5 = arith.divf %3, %4 : vector<8x1xf32>
    %cst_2 = arith.constant 9.99999974E-6 : f32
    %6 = vector.broadcast %cst_2 : f32 to vector<8x1xf32>
    %7 = arith.addf %5, %6 : vector<8x1xf32>
    %8 = math.rsqrt %7 : vector<8x1xf32>
    %9 = vector.broadcast %8 : vector<8x1xf32> to vector<8x128xf32>
    %10 = arith.mulf %0, %9 : vector<8x128xf32>
    %c0_3 = arith.constant 0 : index
    %c0_4 = arith.constant 0 : index
    %11 = vector.load %arg4[%c0_3, %c0_4] : memref<1x128xf32, #tpu.memory_space<vmem>>, vector<1x128xf32>
    %12 = vector.broadcast %11 : vector<1x128xf32> to vector<8x128xf32>
    %13 = arith.mulf %10, %12 : vector<8x128xf32>
    %14 = arith.truncf %13 : vector<8x128xf32> to vector<8x128xbf16>
    %c0_5 = arith.constant 0 : index
    %c0_6 = arith.constant 0 : index
    %15 = vector.load %arg6[%c0_5, %c0_6] : memref<128x256xbf16, #tpu.memory_space<vmem>>, vector<128x256xbf16>
    %cst_7 = arith.constant dense<0.000000e+00> : vector<8x256xf32>
    %16 = tpu.matmul %14, %15, %cst_7 {dimension_numbers = #tpu.dot_dimension_numbers<[1], [0], [0], [1], [0, 0, 1, 1], [], []>} : vector<8x128xbf16>, vector<128x256xbf16>, vector<8x256xf32> -> vector<8x256xf32>
    %17 = vector.extract_strided_slice %16 {offsets = [0, 0], sizes = [8, 128], strides = [1, 1]} : vector<8x256xf32> to vector<8x128xf32>
    %18 = vector.extract_strided_slice %16 {offsets = [0, 128], sizes = [8, 64], strides = [1, 1]} : vector<8x256xf32> to vector<8x64xf32>
    %19 = vector.extract_strided_slice %16 {offsets = [0, 192], sizes = [8, 64], strides = [1, 1]} : vector<8x256xf32> to vector<8x64xf32>
    %c0_8 = arith.constant 0 : index
    %c0_9 = arith.constant 0 : index
    %20 = vector.load %arg2[%c0_8, %c0_9] : memref<8x32xf32, #tpu.memory_space<vmem>>, vector<8x32xf32>
    %c0_10 = arith.constant 0 : index
    %c0_11 = arith.constant 0 : index
    %21 = vector.load %arg3[%c0_10, %c0_11] : memref<8x32xf32, #tpu.memory_space<vmem>>, vector<8x32xf32>
    %22 = tpu.iota {dimensions = array<i32: 0>} : vector<16x8xi32>
    %23 = tpu.iota {dimensions = array<i32: 1>} : vector<16x8xi32>
    %c8_i32 = arith.constant 8 : i32
    %c0_i32 = arith.constant 0 : i32
    %24 = arith.cmpi eq, %c8_i32, %c0_i32 : i32
    %c1_i32 = arith.constant 1 : i32
    %25 = arith.select %24, %c1_i32, %c8_i32 : i32
    %26 = vector.broadcast %25 : i32 to vector<16x8xi32>
    %27 = arith.remsi %22, %26 : vector<16x8xi32>
    %c0_i32_12 = arith.constant 0 : i32
    %28 = vector.broadcast %c0_i32_12 : i32 to vector<16x8xi32>
    %29 = arith.cmpi ne, %27, %28 : vector<16x8xi32>
    %c0_i32_13 = arith.constant 0 : i32
    %30 = vector.broadcast %c0_i32_13 : i32 to vector<16x8xi32>
    %31 = arith.cmpi slt, %27, %30 : vector<16x8xi32>
    %c0_i32_14 = arith.constant 0 : i32
    %32 = arith.cmpi slt, %25, %c0_i32_14 : i32
    %33 = vector.broadcast %32 : i1 to vector<16x8xi1>
    %34 = vector.broadcast %33 : vector<16x8xi1> to vector<16x8xi1>
    %35 = arith.xori %31, %34 : vector<16x8xi1>
    %36 = arith.andi %35, %29 : vector<16x8xi1>
    %37 = vector.broadcast %25 : i32 to vector<16x8xi32>
    %38 = arith.addi %27, %37 : vector<16x8xi32>
    %39 = arith.select %36, %38, %27 : vector<16x8xi1>, vector<16x8xi32>
    %40 = arith.cmpi sge, %39, %23 : vector<16x8xi32>
    %cst_15 = arith.constant 0.000000e+00 : f32
    %41 = vector.broadcast %cst_15 : f32 to vector<8x128xf32>
    %42 = vector.extract_strided_slice %18 {offsets = [0, 0], sizes = [8, 32], strides = [1, 1]} : vector<8x64xf32> to vector<8x32xf32>
    %43 = arith.mulf %42, %20 : vector<8x32xf32>
    %c16_i32 = arith.constant 16 : i32
    %44 = tpu.dynamic_rotate %42 by %c16_i32 dim 1 : vector<8x32xf32>, i32 -> vector<8x32xf32>
    %45 = arith.mulf %44, %21 : vector<8x32xf32>
    %46 = arith.addf %43, %45 : vector<8x32xf32>
    %47 = arith.truncf %46 : vector<8x32xf32> to vector<8x32xbf16>
    %48 = vector.extract_strided_slice %19 {offsets = [0, 0], sizes = [8, 32], strides = [1, 1]} : vector<8x64xf32> to vector<8x32xf32>
    %49 = arith.truncf %48 : vector<8x32xf32> to vector<8x32xbf16>
    %50 = vector.extract_strided_slice %17 {offsets = [0, 0], sizes = [8, 32], strides = [1, 1]} : vector<8x128xf32> to vector<8x32xf32>
    %51 = arith.mulf %50, %20 : vector<8x32xf32>
    %c16_i32_16 = arith.constant 16 : i32
    %52 = tpu.dynamic_rotate %50 by %c16_i32_16 dim 1 : vector<8x32xf32>, i32 -> vector<8x32xf32>
    %53 = arith.mulf %52, %21 : vector<8x32xf32>
    %54 = arith.addf %51, %53 : vector<8x32xf32>
    %55 = vector.extract_strided_slice %17 {offsets = [0, 32], sizes = [8, 32], strides = [1, 1]} : vector<8x128xf32> to vector<8x32xf32>
    %56 = arith.mulf %55, %20 : vector<8x32xf32>
    %c16_i32_17 = arith.constant 16 : i32
    %57 = tpu.dynamic_rotate %55 by %c16_i32_17 dim 1 : vector<8x32xf32>, i32 -> vector<8x32xf32>
    %58 = arith.mulf %57, %21 : vector<8x32xf32>
    %59 = arith.addf %56, %58 : vector<8x32xf32>
    %60 = tpu.concatenate %54, %59 in 0 : vector<8x32xf32>, vector<8x32xf32> -> vector<16x32xf32>
    %61 = arith.truncf %60 : vector<16x32xf32> to vector<16x32xbf16>
    %cst_18 = arith.constant dense<0.000000e+00> : vector<16x8xf32>
    %62 = tpu.matmul %61, %47, %cst_18 {dimension_numbers = #tpu.dot_dimension_numbers<[1], [1], [0], [0], [0, 0, 1, 0], [], []>} : vector<16x32xbf16>, vector<8x32xbf16>, vector<16x8xf32> -> vector<16x8xf32>
    %cst_19 = arith.constant -1.000000e+30 : f32
    %63 = vector.broadcast %cst_19 : f32 to vector<16x8xf32>
    %64 = arith.select %40, %62, %63 : vector<16x8xi1>, vector<16x8xf32>
    %cst_20 = arith.constant dense<0xFF800000> : vector<16xf32>
    %65 = vector.multi_reduction <maximumf>, %64, %cst_20 [1] : vector<16x8xf32> to vector<16xf32>
    %66 = vector.shape_cast %65 : vector<16xf32> to vector<16x1xf32>
    %67 = vector.broadcast %66 : vector<16x1xf32> to vector<16x8xf32>
    %68 = arith.subf %64, %67 : vector<16x8xf32>
    %69 = math.exp %68 : vector<16x8xf32>
    %cst_21 = arith.constant dense<0.000000e+00> : vector<16xf32>
    %70 = vector.multi_reduction <add>, %69, %cst_21 [1] : vector<16x8xf32> to vector<16xf32>
    %71 = vector.shape_cast %70 : vector<16xf32> to vector<16x1xf32>
    %72 = tpu.reciprocal %71 {approx = true} : vector<16x1xf32> -> vector<16x1xf32>
    %73 = vector.broadcast %72 : vector<16x1xf32> to vector<16x8xf32>
    %74 = arith.mulf %69, %73 : vector<16x8xf32>
    %75 = arith.truncf %74 : vector<16x8xf32> to vector<16x8xbf16>
    %cst_22 = arith.constant dense<0.000000e+00> : vector<16x32xf32>
    %76 = tpu.matmul %75, %49, %cst_22 {dimension_numbers = #tpu.dot_dimension_numbers<[1], [0], [0], [1], [0, 0, 1, 1], [], []>} : vector<16x8xbf16>, vector<8x32xbf16>, vector<16x32xf32> -> vector<16x32xf32>
    %77 = vector.extract_strided_slice %76 {offsets = [0, 0], sizes = [8, 32], strides = [1, 1]} : vector<16x32xf32> to vector<8x32xf32>
    %78 = arith.truncf %77 : vector<8x32xf32> to vector<8x32xbf16>
    %c0_23 = arith.constant 0 : index
    %c0_24 = arith.constant 0 : index
    %79 = vector.load %arg7[%c0_23, %c0_24] : memref<128x128xbf16, #tpu.memory_space<vmem>>, vector<32x128xbf16>
    %cst_25 = arith.constant dense<0.000000e+00> : vector<8x128xf32>
    %80 = tpu.matmul %78, %79, %cst_25 {dimension_numbers = #tpu.dot_dimension_numbers<[1], [0], [0], [1], [0, 0, 1, 1], [], []>} : vector<8x32xbf16>, vector<32x128xbf16>, vector<8x128xf32> -> vector<8x128xf32>
    %81 = arith.addf %41, %80 : vector<8x128xf32>
    %82 = vector.extract_strided_slice %76 {offsets = [8, 0], sizes = [8, 32], strides = [1, 1]} : vector<16x32xf32> to vector<8x32xf32>
    %83 = arith.truncf %82 : vector<8x32xf32> to vector<8x32xbf16>
    %c32 = arith.constant 32 : index
    %c0_26 = arith.constant 0 : index
    %84 = vector.load %arg7[%c32, %c0_26] : memref<128x128xbf16, #tpu.memory_space<vmem>>, vector<32x128xbf16>
    %cst_27 = arith.constant dense<0.000000e+00> : vector<8x128xf32>
    %85 = tpu.matmul %83, %84, %cst_27 {dimension_numbers = #tpu.dot_dimension_numbers<[1], [0], [0], [1], [0, 0, 1, 1], [], []>} : vector<8x32xbf16>, vector<32x128xbf16>, vector<8x128xf32> -> vector<8x128xf32>
    %86 = arith.addf %81, %85 : vector<8x128xf32>
    %87 = vector.extract_strided_slice %18 {offsets = [0, 32], sizes = [8, 32], strides = [1, 1]} : vector<8x64xf32> to vector<8x32xf32>
    %88 = arith.mulf %87, %20 : vector<8x32xf32>
    %c16_i32_28 = arith.constant 16 : i32
    %89 = tpu.dynamic_rotate %87 by %c16_i32_28 dim 1 : vector<8x32xf32>, i32 -> vector<8x32xf32>
    %90 = arith.mulf %89, %21 : vector<8x32xf32>
    %91 = arith.addf %88, %90 : vector<8x32xf32>
    %92 = arith.truncf %91 : vector<8x32xf32> to vector<8x32xbf16>
    %93 = vector.extract_strided_slice %19 {offsets = [0, 32], sizes = [8, 32], strides = [1, 1]} : vector<8x64xf32> to vector<8x32xf32>
    %94 = arith.truncf %93 : vector<8x32xf32> to vector<8x32xbf16>
    %95 = vector.extract_strided_slice %17 {offsets = [0, 64], sizes = [8, 32], strides = [1, 1]} : vector<8x128xf32> to vector<8x32xf32>
    %96 = arith.mulf %95, %20 : vector<8x32xf32>
    %c16_i32_29 = arith.constant 16 : i32
    %97 = tpu.dynamic_rotate %95 by %c16_i32_29 dim 1 : vector<8x32xf32>, i32 -> vector<8x32xf32>
    %98 = arith.mulf %97, %21 : vector<8x32xf32>
    %99 = arith.addf %96, %98 : vector<8x32xf32>
    %100 = vector.extract_strided_slice %17 {offsets = [0, 96], sizes = [8, 32], strides = [1, 1]} : vector<8x128xf32> to vector<8x32xf32>
    %101 = arith.mulf %100, %20 : vector<8x32xf32>
    %c16_i32_30 = arith.constant 16 : i32
    %102 = tpu.dynamic_rotate %100 by %c16_i32_30 dim 1 : vector<8x32xf32>, i32 -> vector<8x32xf32>
    %103 = arith.mulf %102, %21 : vector<8x32xf32>
    %104 = arith.addf %101, %103 : vector<8x32xf32>
    %105 = tpu.concatenate %99, %104 in 0 : vector<8x32xf32>, vector<8x32xf32> -> vector<16x32xf32>
    %106 = arith.truncf %105 : vector<16x32xf32> to vector<16x32xbf16>
    %cst_31 = arith.constant dense<0.000000e+00> : vector<16x8xf32>
    %107 = tpu.matmul %106, %92, %cst_31 {dimension_numbers = #tpu.dot_dimension_numbers<[1], [1], [0], [0], [0, 0, 1, 0], [], []>} : vector<16x32xbf16>, vector<8x32xbf16>, vector<16x8xf32> -> vector<16x8xf32>
    %cst_32 = arith.constant -1.000000e+30 : f32
    %108 = vector.broadcast %cst_32 : f32 to vector<16x8xf32>
    %109 = arith.select %40, %107, %108 : vector<16x8xi1>, vector<16x8xf32>
    %cst_33 = arith.constant dense<0xFF800000> : vector<16xf32>
    %110 = vector.multi_reduction <maximumf>, %109, %cst_33 [1] : vector<16x8xf32> to vector<16xf32>
    %111 = vector.shape_cast %110 : vector<16xf32> to vector<16x1xf32>
    %112 = vector.broadcast %111 : vector<16x1xf32> to vector<16x8xf32>
    %113 = arith.subf %109, %112 : vector<16x8xf32>
    %114 = math.exp %113 : vector<16x8xf32>
    %cst_34 = arith.constant dense<0.000000e+00> : vector<16xf32>
    %115 = vector.multi_reduction <add>, %114, %cst_34 [1] : vector<16x8xf32> to vector<16xf32>
    %116 = vector.shape_cast %115 : vector<16xf32> to vector<16x1xf32>
    %117 = tpu.reciprocal %116 {approx = true} : vector<16x1xf32> -> vector<16x1xf32>
    %118 = vector.broadcast %117 : vector<16x1xf32> to vector<16x8xf32>
    %119 = arith.mulf %114, %118 : vector<16x8xf32>
    %120 = arith.truncf %119 : vector<16x8xf32> to vector<16x8xbf16>
    %cst_35 = arith.constant dense<0.000000e+00> : vector<16x32xf32>
    %121 = tpu.matmul %120, %94, %cst_35 {dimension_numbers = #tpu.dot_dimension_numbers<[1], [0], [0], [1], [0, 0, 1, 1], [], []>} : vector<16x8xbf16>, vector<8x32xbf16>, vector<16x32xf32> -> vector<16x32xf32>
    %122 = vector.extract_strided_slice %121 {offsets = [0, 0], sizes = [8, 32], strides = [1, 1]} : vector<16x32xf32> to vector<8x32xf32>
    %123 = arith.truncf %122 : vector<8x32xf32> to vector<8x32xbf16>
    %c64 = arith.constant 64 : index
    %c0_36 = arith.constant 0 : index
    %124 = vector.load %arg7[%c64, %c0_36] : memref<128x128xbf16, #tpu.memory_space<vmem>>, vector<32x128xbf16>
    %cst_37 = arith.constant dense<0.000000e+00> : vector<8x128xf32>
    %125 = tpu.matmul %123, %124, %cst_37 {dimension_numbers = #tpu.dot_dimension_numbers<[1], [0], [0], [1], [0, 0, 1, 1], [], []>} : vector<8x32xbf16>, vector<32x128xbf16>, vector<8x128xf32> -> vector<8x128xf32>
    %126 = arith.addf %86, %125 : vector<8x128xf32>
    %127 = vector.extract_strided_slice %121 {offsets = [8, 0], sizes = [8, 32], strides = [1, 1]} : vector<16x32xf32> to vector<8x32xf32>
    %128 = arith.truncf %127 : vector<8x32xf32> to vector<8x32xbf16>
    %c96 = arith.constant 96 : index
    %c0_38 = arith.constant 0 : index
    %129 = vector.load %arg7[%c96, %c0_38] : memref<128x128xbf16, #tpu.memory_space<vmem>>, vector<32x128xbf16>
    %cst_39 = arith.constant dense<0.000000e+00> : vector<8x128xf32>
    %130 = tpu.matmul %128, %129, %cst_39 {dimension_numbers = #tpu.dot_dimension_numbers<[1], [0], [0], [1], [0, 0, 1, 1], [], []>} : vector<8x32xbf16>, vector<32x128xbf16>, vector<8x128xf32> -> vector<8x128xf32>
    %131 = arith.addf %126, %130 : vector<8x128xf32>
    %132 = arith.addf %131, %0 : vector<8x128xf32>
    %c0_40 = arith.constant 0 : index
    %c0_41 = arith.constant 0 : index
    %133 = vector.load %arg11[%c0_40, %c0_41] : memref<8x128xf32, #tpu.memory_space<vmem>>, vector<8x128xf32>
    tpu.vector_store %arg11[%c0_40, %c0_41], %132 {strides = array<i32>} : memref<8x128xf32, #tpu.memory_space<vmem>>, vector<8x128xf32>,
    %134 = arith.mulf %132, %132 : vector<8x128xf32>
    %cst_42 = arith.constant dense<0.000000e+00> : vector<8xf32>
    %135 = vector.multi_reduction <add>, %134, %cst_42 [1] : vector<8x128xf32> to vector<8xf32>
    %136 = vector.shape_cast %135 : vector<8xf32> to vector<8x1xf32>
    %cst_43 = arith.constant 1.280000e+02 : f32
    %137 = vector.broadcast %cst_43 : f32 to vector<8x1xf32>
    %138 = arith.divf %136, %137 : vector<8x1xf32>
    %cst_44 = arith.constant 9.99999974E-6 : f32
    %139 = vector.broadcast %cst_44 : f32 to vector<8x1xf32>
    %140 = arith.addf %138, %139 : vector<8x1xf32>
    %141 = math.rsqrt %140 : vector<8x1xf32>
    %142 = vector.broadcast %141 : vector<8x1xf32> to vector<8x128xf32>
    %143 = arith.mulf %132, %142 : vector<8x128xf32>
    %c0_45 = arith.constant 0 : index
    %c0_46 = arith.constant 0 : index
    %144 = vector.load %arg5[%c0_45, %c0_46] : memref<1x128xf32, #tpu.memory_space<vmem>>, vector<1x128xf32>
    %145 = vector.broadcast %144 : vector<1x128xf32> to vector<8x128xf32>
    %146 = arith.mulf %143, %145 : vector<8x128xf32>
    %147 = arith.truncf %146 : vector<8x128xf32> to vector<8x128xbf16>
    %c0_47 = arith.constant 0 : index
    %c0_48 = arith.constant 0 : index
    %148 = vector.load %arg8[%c0_47, %c0_48] : memref<128x512xbf16, #tpu.memory_space<vmem>>, vector<128x512xbf16>
    %cst_49 = arith.constant dense<0.000000e+00> : vector<8x512xf32>
    %149 = tpu.matmul %147, %148, %cst_49 {dimension_numbers = #tpu.dot_dimension_numbers<[1], [0], [0], [1], [0, 0, 1, 1], [], []>} : vector<8x128xbf16>, vector<128x512xbf16>, vector<8x512xf32> -> vector<8x512xf32>
    %150 = vector.extract_strided_slice %149 {offsets = [0, 0], sizes = [8, 256], strides = [1, 1]} : vector<8x512xf32> to vector<8x256xf32>
    %151 = vector.extract_strided_slice %149 {offsets = [0, 256], sizes = [8, 256], strides = [1, 1]} : vector<8x512xf32> to vector<8x256xf32>
    %152 = arith.negf %150 : vector<8x256xf32>
    %153 = math.exp %152 : vector<8x256xf32>
    %cst_50 = arith.constant 1.000000e+00 : f32
    %154 = vector.broadcast %cst_50 : f32 to vector<8x256xf32>
    %155 = arith.addf %154, %153 : vector<8x256xf32>
    %156 = arith.divf %154, %155 : vector<8x256xf32>
    %157 = arith.mulf %150, %156 : vector<8x256xf32>
    %158 = arith.mulf %157, %151 : vector<8x256xf32>
    %159 = arith.truncf %158 : vector<8x256xf32> to vector<8x256xbf16>
    %c0_51 = arith.constant 0 : index
    %c0_52 = arith.constant 0 : index
    %160 = vector.load %arg9[%c0_51, %c0_52] : memref<256x128xbf16, #tpu.memory_space<vmem>>, vector<256x128xbf16>
    %cst_53 = arith.constant dense<0.000000e+00> : vector<8x128xf32>
    %161 = tpu.matmul %159, %160, %cst_53 {dimension_numbers = #tpu.dot_dimension_numbers<[1], [0], [0], [1], [0, 0, 1, 1], [], []>} : vector<8x256xbf16>, vector<256x128xbf16>, vector<8x128xf32> -> vector<8x128xf32>
    %c0_54 = arith.constant 0 : index
    %c0_55 = arith.constant 0 : index
    %162 = vector.load %arg10[%c0_54, %c0_55] : memref<8x128xf32, #tpu.memory_space<vmem>>, vector<8x128xf32>
    tpu.vector_store %arg10[%c0_54, %c0_55], %161 {strides = array<i32>} : memref<8x128xf32, #tpu.memory_space<vmem>>, vector<8x128xf32>,
    return
  }
  func.func @transform_0(%arg0: i32) -> (i32, i32) {
    %c0_i32 = arith.constant 0 : i32
    %c0_i32_0 = arith.constant 0 : i32
    %c0_i32_1 = arith.constant 0 : i32
    return %c0_i32, %c0_i32_0 : i32, i32
  }
  func.func @transform_1(%arg0: i32) -> (i32, i32) {
    %c0_i32 = arith.constant 0 : i32
    %c0_i32_0 = arith.constant 0 : i32
    %c0_i32_1 = arith.constant 0 : i32
    return %c0_i32, %c0_i32_0 : i32, i32
  }
  func.func @transform_2(%arg0: i32) -> (i32, i32) {
    %c0_i32 = arith.constant 0 : i32
    %c0_i32_0 = arith.constant 0 : i32
    %c0_i32_1 = arith.constant 0 : i32
    return %c0_i32, %c0_i32_0 : i32, i32
  }
  func.func @transform_3(%arg0: i32) -> (i32, i32) {
    %c0_i32 = arith.constant 0 : i32
    %c0_i32_0 = arith.constant 0 : i32
    %c0_i32_1 = arith.constant 0 : i32
    return %c0_i32, %c0_i32_0 : i32, i32
  }
  func.func @transform_4(%arg0: i32) -> (i32, i32) {
    %c0_i32 = arith.constant 0 : i32
    %c0_i32_0 = arith.constant 0 : i32
    %c0_i32_1 = arith.constant 0 : i32
    return %c0_i32, %c0_i32_0 : i32, i32
  }
  func.func @transform_5(%arg0: i32) -> (i32, i32) {
    %c0_i32 = arith.constant 0 : i32
    %c0_i32_0 = arith.constant 0 : i32
    %c0_i32_1 = arith.constant 0 : i32
    return %c0_i32, %c0_i32_0 : i32, i32
  }
  func.func @transform_6(%arg0: i32) -> (i32, i32) {
    %c0_i32 = arith.constant 0 : i32
    %c0_i32_0 = arith.constant 0 : i32
    %c0_i32_1 = arith.constant 0 : i32
    return %c0_i32, %c0_i32_0 : i32, i32
  }
  func.func @transform_7(%arg0: i32) -> (i32, i32) {
    %c0_i32 = arith.constant 0 : i32
    %c0_i32_0 = arith.constant 0 : i32
    %c0_i32_1 = arith.constant 0 : i32
    return %c0_i32, %c0_i32_0 : i32, i32
  }
  func.func @transform_8(%arg0: i32) -> (i32, i32) {
    %c0_i32 = arith.constant 0 : i32
    %c0_i32_0 = arith.constant 0 : i32
    %c0_i32_1 = arith.constant 0 : i32
    return %c0_i32, %c0_i32_0 : i32, i32
  }
  func.func @transform_9(%arg0: i32) -> (i32, i32) {
    %c0_i32 = arith.constant 0 : i32
    %c0_i32_0 = arith.constant 0 : i32
    %c0_i32_1 = arith.constant 0 : i32
    return %c0_i32, %c0_i32_0 : i32, i32
  }
  func.func @transform_10(%arg0: i32) -> (i32, i32) {
    %c0_i32 = arith.constant 0 : i32
    %c0_i32_0 = arith.constant 0 : i32
    %c0_i32_1 = arith.constant 0 : i32
    return %c0_i32, %c0_i32_0 : i32, i32
  }
}

</mosaic_0001>

<bundles_post_ra>
// kernel: llama_decoder_layer.1
= control target key start
LH: loop header
LB: loop body
LE: loop exit
PB: predicated region body
PF: predicated region fallthrough
CT: control target
= control target key end

     0   :  { %16 = vsyncpa [#allocation3], 0  ;;  %s2027_s0 = inlined_call_operand.hbm [shape: f32[8,128], index: 0, kind: input, shape index: {}, may-alias: {0,9}]   ;;  %s2028_s1 = inlined_call_operand.vmem [shape: f32[8,32], index: 1, kind: input, shape index: {}]   ;;  %s2029_s2 = inlined_call_operand.vmem [shape: f32[8,32], index: 2, kind: input, shape index: {}]   ;;  %s2030_s3 = inlined_call_operand.vmem [shape: f32[1,128], index: 3, kind: input, shape index: {}]   ;;  %s2031_s4 = inlined_call_operand.vmem [shape: f32[1,128], index: 4, kind: input, shape index: {}]   ;;  %s2032_s5 = inlined_call_operand.hbm [shape: bf16[128,256], index: 5, kind: input, shape index: {}]   ;;  %s2033_s6 = inlined_call_operand.vmem [shape: bf16[128,128], index: 6, kind: input, shape index: {}]   ;;  %s2034_s7 = inlined_call_operand.hbm [shape: bf16[128,512], index: 7, kind: input, shape index: {}]   ;;  %s2035_s8 = inlined_call_operand.hbm [shape: bf16[256,128], index: 8, kind: input, shape index: {}]   ;;  %s2036_s9 = inlined_call_operand.hbm [shape: f32[8,128], index: 9, kind: output, shape index: {0}, may-alias: {0,9}]   ;;  %s2037_s10 = inlined_call_operand.hbm [shape: f32[8,128], index: 10, kind: output, shape index: {1}]  }
   0x1   :  { %17 = vsyncpa [#allocation6], 0 }
   0x2   :  { %18 = vsyncpa [#allocation9], 0 }
   0x3   :  { %19 = vsyncpa [#allocation4], 0  ;;  %s44_s15 = sshll.u32 %s2032_s5, 4  ;;  %s45_s15 = int_to_ptr.hbm [resolvable:$true] %s44_s15 }
   0x4   :  { %20 = vsyncpa [#allocation12], 0  ;;  %s1757_s16 = smov [#allocation5]   ;;  %s26_s20 = sshll.u32 %s2027_s0, 4  ;;  %s27_s20 = int_to_ptr.hbm [resolvable:$true] %s26_s20 }
   0x5   :  { %s46_s17 = sshll.u32 %s1757_s16, 4  ;;  %s1758_s21 = smov 128   ;;  %s47_s17 = int_to_ptr.vmem [resolvable:$true] %s46_s17 }
   0x6   :  { %s1759_s22 = smov 8   ;;  %s1760_s23 = smov [#allocation2]  }
   0x7   :  { %52 = dma.hbm_to_vmem [thread:$0]  %s45_s15, 2048, %s47_s17, [#allocation6], %s1758_s21, %s1758_s21, %s1759_s22  }
   0x8   :  { %s28_s24 = sshll.u32 %s1760_s23, 4  ;;  %s59_s27 = sshll.u32 %s2034_s7, 4  ;;  %s29_s24 = int_to_ptr.vmem [resolvable:$true] %s28_s24  ;;  %s60_s27 = int_to_ptr.hbm [resolvable:$true] %s59_s27 }
   0x9   :  { %31 = dma.hbm_to_vmem [thread:$0]  %s27_s20, 128, %s29_s24, [#allocation3]  }
   0xa   :  { %s1761_s5 = smov [#allocation7]   ;;  %s72_s0 = sshll.u32 %s2035_s8, 4  ;;  %s73_s0 = int_to_ptr.hbm [resolvable:$true] %s72_s0 }
   0xb   :  { %s61_s28 = sshll.u32 %s1761_s5, 4  ;;  %s1762_s11 = smov 256   ;;  %s62_s28 = int_to_ptr.vmem [resolvable:$true] %s61_s28 }
   0xc   :  { %s1763_s12 = smov 16   ;;  %s1764_s13 = smov [#allocation8]  }
   0xd   :  { %67 = dma.hbm_to_vmem [thread:$0]  %s60_s27, 4096, %s62_s28, [#allocation6], %s1762_s11, %s1762_s11, %s1763_s12  }
   0xe   :  { %s74_s14 = sshll.u32 %s1764_s13, 4  ;;  %s1765_s15 = smov 64   ;;  %s75_s14 = int_to_ptr.vmem [resolvable:$true] %s74_s14 }
   0xf   :  { %s1766_s7 = smov 4  }
  0x10   :  { %80 = dma.hbm_to_vmem [thread:$0]  %s73_s0, 2048, %s75_s14, [#allocation9], %s1765_s15, %s1765_s15, %s1766_s7  }
  0x11   :  { %1747 = dma.done.wait [#allocation3], 128  }
  0x12   :  { %1748 = vsyncadd [#allocation3], 4294967168 }
  0x13   :  { %1749 = dma.done.wait [#allocation6], 6144  }
  0x14   :  { %1750 = vsyncadd [#allocation6], 4294961152 }
  0x15   :  { %1751 = dma.done.wait [#allocation9], 2048  }
  0x16   :  { %1752 = vsyncadd [#allocation9], 4294965248  ;;  %v1845_v0 = vld [vmem:[#allocation2] sm:$0xff]  ;;  %v1241_v1 = vld [vmem:[#allocation5 + $0x70] sm:$0xf]  ;;  %v1767_v17 = vmov 128.0  }
  0x17   :  { %v1496_v2 = vld [vmem:[#allocation5 + $0x74] sm:$0xf0]  ;;  %v99_v3 = vmul.f32 %v1845_v0, %v1845_v0  ;;  %v1495_v5 = vld [vmem:[#allocation5 + $0x74] sm:$0xf]  ;;  %v1243_v6 = vld [vmem:[#allocation5 + $0x78] sm:$0xf0]  ;;  %1573 = vrcp.f32 %v1767_v17 }
  0x18   :  { %v1242_v4 = vor.u32 %v1496_v2, %v1241_v1  ;;  %v1246_v7 = vor.u32 %v1495_v5, %v1243_v6  ;;  %v1233_v8 = vld [vmem:[#allocation5 + $0x60] sm:$0xf]  ;;  %v1494_v9 = vld [vmem:[#allocation5 + $0x64] sm:$0xf0]  ;;  %v1493_v10 = vld [vmem:[#allocation5 + $0x64] sm:$0xf] }
  0x19   :  { %100 = vadd.xlane.f32.xlu0 %v99_v3  ;;  %v1234_v11 = vor.u32 %v1494_v9, %v1233_v8  ;;  %v1235_v12 = vld [vmem:[#allocation5 + $0x68] sm:$0xf0]  ;;  %v1225_v14 = vld [vmem:[#allocation5 + $0x50] sm:$0xf]  ;;  %v1492_v15 = vld [vmem:[#allocation5 + $0x54] sm:$0xf0] }
  0x1a   :  { %224 = vmatpush.bf16.msra.mxu0 %v1242_v4  ;;  %237 = vmatpush.bf16.msra.mxu1 %v1246_v7  ;;  %v1238_v13 = vor.u32 %v1493_v10, %v1235_v12  ;;  %v1491_v16 = vld [vmem:[#allocation5 + $0x54] sm:$0xf]  ;;  %v1226_v18 = vor.u32 %v1492_v15, %v1225_v14  ;;  %v1227_v19 = vld [vmem:[#allocation5 + $0x58] sm:$0xf0]  ;;  %v1217_v21 = vld [vmem:[#allocation5 + $0x40] sm:$0xf] }
  0x1b   :  { %v1230_v20 = vor.u32 %v1491_v16, %v1227_v19  ;;  %v1490_v22 = vld [vmem:[#allocation5 + $0x44] sm:$0xf0]  ;;  %v1489_v23 = vld [vmem:[#allocation5 + $0x44] sm:$0xf]  ;;  %v1219_v25 = vld [vmem:[#allocation5 + $0x48] sm:$0xf0] }
  0x1c   :  { %v1218_v24 = vor.u32 %v1490_v22, %v1217_v21  ;;  %v1222_v26 = vor.u32 %v1489_v23, %v1219_v25  ;;  %v1209_v28 = vld [vmem:[#allocation5 + $0x30] sm:$0xf]  ;;  %v1488_v29 = vld [vmem:[#allocation5 + $0x34] sm:$0xf0]  ;;  %v1487_v30 = vld [vmem:[#allocation5 + $0x34] sm:$0xf] }
  0x1d   :  { %v1574_v27 = vpop.eup %1573  ;;  %v1210_v31 = vor.u32 %v1488_v29, %v1209_v28  ;;  %v1211_v32 = vld [vmem:[#allocation5 + $0x38] sm:$0xf0]  ;;  %v1201_v35 = vld [vmem:[#allocation5 + $0x20] sm:$0xf]  ;;  %v1486_v36 = vld [vmem:[#allocation5 + $0x24] sm:$0xf0] }
  0x1e   :  { %225 = vmatpush.bf16.msra.mxu0 %v1234_v11  ;;  %238 = vmatpush.bf16.msra.mxu1 %v1238_v13  ;;  %v103_v33 = vmul.f32 128.0, %v1574_v27  ;;  %v1214_v34 = vor.u32 %v1487_v30, %v1211_v32  ;;  %v1485_v37 = vld [vmem:[#allocation5 + $0x24] sm:$0xf]  ;;  %v1202_v38 = vor.u32 %v1486_v36, %v1201_v35  ;;  %v1203_v39 = vld [vmem:[#allocation5 + $0x28] sm:$0xf0]  ;;  %vm107_vm0 = vweird.f32 %v1574_v27  ;;  %s1768_s17 = smov 32  }
  0x1f   :  { %v1206_v41 = vor.u32 %v1485_v37, %v1203_v39  ;;  %v1193_v42 = vld [vmem:[#allocation5 + $0x10] sm:$0xf]  ;;  %v1484_v43 = vld [vmem:[#allocation5 + $0x14] sm:$0xf0]  ;;  %v1483_v44 = vld [vmem:[#allocation5 + $0x14] sm:$0xf] }
  0x20   :  { %v104_v40 = vsub.f32 1.0, %v103_v33  ;;  %v1194_v45 = vor.u32 %v1484_v43, %v1193_v42  ;;  %v1195_v46 = vld [vmem:[#allocation5 + $0x18] sm:$0xf0]  ;;  %v1185_v47 = vld [vmem:[#allocation5] sm:$0xf]  ;;  %s1769_s18 = smov 96  }
  0x21   :  { %v1482_v48 = vld [vmem:[#allocation5 + $0x4] sm:$0xf0]  ;;  %v1198_v49 = vor.u32 %v1483_v44, %v1195_v46  ;;  %v1481_v50 = vld [vmem:[#allocation5 + $0x4] sm:$0xf]  ;;  %v1187_v51 = vld [vmem:[#allocation5 + $0x8] sm:$0xf0] }
  0x22   :  { %226 = vmatpush.bf16.msra.mxu0 %v1226_v18  ;;  %239 = vmatpush.bf16.msra.mxu1 %v1230_v20  ;;  %v105_v52 = vmul.f32 %v1574_v27, %v104_v40  ;;  %v1186_v53 = vor.u32 %v1482_v48, %v1185_v47  ;;  %v1190_v54 = vor.u32 %v1481_v50, %v1187_v51  ;;  %v1571_v3 = vld [vmem:[%s2030_s3] ss:$0 sm:$0xff]  ;;  %vm284_vm4 = vcmask 1047808   ;;  %s1770_s21 = smov 112   ;;  %s1772_s29 = smov 48  }
  0x23   :  { %v251_v13 = vld [vmem:[%s2029_s2] sm:$0xff]  ;;  %vm342_vm5 = vcmask 261120   ;;  %vm365_vm7 = vcmask 64512   ;;  %vm395_vm9 = vcmask 1043456   ;;  %s1166_s3 = sshll.u32 %s2037_s10, 4  ;;  %s1774_s19 = smov [#allocation10]   ;;  %s1167_s3 = int_to_ptr.hbm [resolvable:$true] %s1166_s3 }
  0x24   :  { %v106_v55 = vadd.f32 %v1574_v27, %v105_v52  ;;  %v1884_v21 = vld [vmem:[%s2028_s1] sm:$0xff]  ;;  %s1771_s1 = smov 80   ;;  %s1153_s2 = sshll.u32 %s1774_s19, 4  ;;  %s1154_s2 = int_to_ptr.vmem [resolvable:$true] %s1153_s2 }
  0x26   :  { %227 = vmatpush.bf16.msra.mxu0 %v1218_v24  ;;  %240 = vmatpush.bf16.msra.mxu1 %v1222_v26  ;;  %v1849_v56 = vsel %vm107_vm0, %v1574_v27, %v106_v55 }
  0x2a   :  { %228 = vmatpush.bf16.msra.mxu0 %v1210_v31  ;;  %241 = vmatpush.bf16.msra.mxu1 %v1214_v34 }
  0x2e   :  { %229 = vmatpush.bf16.msra.mxu0 %v1202_v38  ;;  %242 = vmatpush.bf16.msra.mxu1 %v1206_v41 }
  0x32   :  { %230 = vmatpush.bf16.msra.mxu0 %v1194_v45  ;;  %243 = vmatpush.bf16.msra.mxu1 %v1198_v49  ;;  %v252_v45 = vlaneseq }
  0x34   :  { %v253_v46 = vshrl.u32 %v252_v45, 7  ;;  %v256_v47 = vand.u32 127, %v252_v45 }
  0x36   :  { %231 = vmatpush.bf16.msra.mxu0 %v1186_v53  ;;  %244 = vmatpush.bf16.msra.mxu1 %v1190_v54  ;;  %v261_v48 = vand.u32 7, %v253_v46  ;;  %v254_v50 = vadd.s32 8, %v253_v46 }
  0x38   :  { %vm1912_vm6 = vcmp.ge.s32.totalorder %v261_v48, %v256_v47  ;;  %v268_v54 = vand.u32 7, %v254_v50 }
  0x3a   :  { %vm1919_vm8 = vcmp.ge.s32.totalorder %v268_v54, %v256_v47 }
  0x8c   :  { %v101_v57 = vpop.xlane.xlu0 %100 }
  0x8d   :  { %v109_v58 = vmul.f32 %v1849_v56, %v101_v57 }
  0x8f   :  { %v110_v59 = vadd.f32 1e-05, %v109_v58 }
  0x91   :  { %1575 = vrsqrt.f32 %v110_v59  ;;  %vm117_vm2 = vweird.f32 %v110_v59 }
  0x97   :  { %v1576_v60 = vpop.eup %1575 }
  0x98   :  { %v112_v61 = vmul.f32 %v1576_v60, %v110_v59  ;;  %vm118_vm1 = vweird.f32 %v1576_v60 }
  0x99   :  { %vm119_vm3 = vmor %vm117_vm2, %vm118_vm1 }
  0x9a   :  { %v113_v62 = vmul.f32 %v1576_v60, %v112_v61 }
  0x9c   :  { %v114_v63 = vmul.f32 0.5, %v113_v62 }
  0x9e   :  { %v115_v1 = vsub.f32 1.5, %v114_v63 }
  0xa0   :  { %v116_v2 = vmul.f32 %v1576_v60, %v115_v1 }
  0xa2   :  { %v120_v4 = vsel %vm119_vm3, %v1576_v60, %v116_v2 }
  0xa3   :  { %v121_v5 = vmul.f32 %v120_v4, %v1845_v0 }
  0xa5   :  { %v126_v6 = vmul.f32 %v1571_v3, %v121_v5 }
  0xa7   :  { %v127_v7 = vpack.c.bf16 %v126_v6, %v126_v6 }
  0xa9   :  { %232 = vmatmul.bf16.vlgmr.msra.gmra.mxu0 %v127_v7  ;;  %245 = vmatmul.bf16.vlgmr.msra.gmra.mxu1 %v127_v7 }
 0x126   :  { %v1856_v8 = vpop.f32.mrf.mxu0  ;;  %v1858_v9 = vpop.f32.mrf.mxu1 }
 0x127   :  { %304 = vrot.lane.b32.xlu2 %v1856_v8, %s1768_s17  ;;  %322 = vrot.lane.b32.xlu0 %v1856_v8, %s1769_s18  ;;  %v283_v35 = vmul.f32 %v1884_v21, %v1858_v9  ;;  %v303_v41 = vmul.f32 %v1884_v21, %v1856_v8 }
 0x12e   :  { %v235_v10 = vpop.f32.mrf.mxu0  ;;  %v248_v11 = vpop.f32.mrf.mxu1 }
 0x181   :  { %v305_v14 = vpop.permute.xlu2 %304 }
 0x182   :  { %v306_v15 = vsel %vm284_vm4, %v305_v14, %v1856_v8 }
 0x199   :  { %v323_v12 = vpop.permute.xlu0 %322 }
 0x19a   :  { %325 = vrot.lane.b32.xlu1 %v323_v12, %s1768_s17 }
 0x1a2   :  { %285 = vrot.lane.b32.xlu1 %v1858_v9, %s1768_s17 }
 0x1aa   :  { %292 = vrot.lane.b32.xlu1 %v251_v13, %s1763_s12  ;;  %v1938_v13 = vpack.c.bf16 %v1858_v9, %v1858_v9 }
 0x1b2   :  { %307 = vrot.lane.b32.xlu1 %v306_v15, %s1768_s17 }
 0x20c   :  { %v326_v16 = vpop.permute.xlu1 %325 }
 0x20d   :  { %v327_v17 = vsel %vm284_vm4, %v326_v16, %v323_v12 }
 0x20e   :  { %328 = vrot.lane.b32.xlu2 %v327_v17, %s1768_s17 }
 0x214   :  { %v286_v18 = vpop.permute.xlu1 %285 }
 0x215   :  { %v287_v19 = vsel %vm284_vm4, %v286_v18, %v1858_v9 }
 0x216   :  { %288 = vrot.lane.b32.xlu2 %v287_v19, %s1768_s17 }
 0x21c   :  { %v1879_v20 = vpop.permute.xlu1 %292 }
 0x21e   :  { %317 = vrot.lane.b32.xlu2 %v1884_v21, %s1768_s17 }
 0x224   :  { %v308_v22 = vpop.permute.xlu1 %307 }
 0x225   :  { %v309_v23 = vsel %vm284_vm4, %v308_v22, %v1856_v8 }
 0x226   :  { %v310_v24 = vmul.f32 %v309_v23, %v1879_v20 }
 0x228   :  { %312 = vrot.lane.b32.xlu2 %v310_v24, %s1770_s21 }
 0x268   :  { %v329_v25 = vpop.permute.xlu2 %328 }
 0x269   :  { %v330_v26 = vsel %vm284_vm4, %v329_v25, %v323_v12 }
 0x26a   :  { %v331_v27 = vmul.f32 %v330_v26, %v1879_v20 }
 0x26c   :  { %333 = vrot.lane.b32.xlu0 %v331_v27, %s1763_s12 }
 0x270   :  { %v289_v28 = vpop.permute.xlu2 %288 }
 0x271   :  { %v290_v29 = vsel %vm284_vm4, %v289_v28, %v1858_v9 }
 0x272   :  { %v295_v30 = vmul.f32 %v1879_v20, %v290_v29 }
 0x274   :  { %297 = vrot.lane.b32.xlu1 %v295_v30, %s1770_s21 }
 0x278   :  { %v1897_v31 = vpop.permute.xlu2 %317 }
 0x279   :  { %v320_v32 = vmul.f32 %v1897_v31, %v1856_v8  ;;  %v479_v47 = vmul.f32 %v1897_v31, %v1858_v9 }
 0x282   :  { %v313_v40 = vpop.permute.xlu2 %312 }
 0x283   :  { %v315_v42 = vadd.f32 %v313_v40, %v303_v41  ;;  %v1498_v40 = vld [vmem:[%s2033_s6 + $0x8] sm:$0xff]  ;;  %v1497_v41 = vld [vmem:[%s2033_s6] sm:$0xff] }
 0x284   :  { %472 = vmatpush.bf16.msra.mxu2 %v1498_v40  ;;  %v1401_v40 = vld [vmem:[#allocation7 + $0xe0] sm:$0xf] }
 0x288   :  { %473 = vmatpush.bf16.msra.mxu2 %v1497_v41  ;;  %v1535_v41 = vld [vmem:[#allocation7 + $0xec] sm:$0xf0] }
 0x2de   :  { %v334_v33 = vpop.permute.xlu0 %333 }
 0x2df   :  { %v336_v34 = vadd.f32 %v334_v33, %v320_v32 }
 0x2e1   :  { %338 = vrot.lane.b32.xlu0 %v336_v34, %s1769_s18 }
 0x2e6   :  { %v298_v36 = vpop.permute.xlu1 %297 }
 0x2e7   :  { %v300_v37 = vadd.f32 %v298_v36, %v283_v35 }
 0x2e9   :  { %v301_v38 = vpack.c.bf16 %v300_v37, %v300_v37  ;;  %520 = vrot.lane.b32.xlu0 %v1856_v8, %s1768_s17 }
 0x2eb   :  { %v347_v39 = vsel %vm342_vm5, %v301_v38, 0 }
 0x2ec   :  { %356 = vmatpush.bf16.xpose.msrb.mxu0 %v347_v39 }
 0x2f1   :  { %481 = vrot.lane.b32.xlu0 %v1858_v9, %s1769_s18 }
 0x353   :  { %v339_v43 = vpop.permute.xlu0 %338 }
 0x354   :  { %v341_v44 = vpack.c.bf16 %v339_v43, %v315_v42  ;;  %v1500_v42 = vld [vmem:[%s2033_s6 + $0x18] sm:$0xff]  ;;  %v1499_v43 = vld [vmem:[%s2033_s6 + $0x10] sm:$0xff] }
 0x355   :  { %444 = vmatpush.bf16.msra.mxu3 %v1500_v42  ;;  %v1533_v42 = vld [vmem:[#allocation7 + $0xe4] sm:$0xf] }
 0x356   :  { %1247 = vmatmul.msk.bf16.vlgmr.msrb.gmra.mxu0 %vm342_vm5, %v341_v44 }
 0x359   :  { %445 = vmatpush.bf16.msra.mxu3 %v1499_v43  ;;  %v1402_v43 = vor.u32 %v1535_v41, %v1401_v40 }
 0x35b   :  { %v521_v60 = vpop.permute.xlu0 %520 }
 0x363   :  { %v482_v61 = vpop.permute.xlu0 %481 }
 0x3d3   :  { %v358_v51 = vpop.f32.mrf.mxu0 }
 0x3d4   :  { %v363_v52 = vsel %vm1912_vm6, %v358_v51, -1e+30 }
 0x3d5   :  { %v366_v53 = vsel %vm365_vm7, %v363_v52, -inf }
 0x3d6   :  { %367 = vmax.xlane.f32.xlu1 %v366_v53 }
 0x3db   :  { %v360_v57 = vpop.f32.mrf.mxu0 }
 0x3dc   :  { %v364_v58 = vsel %vm1919_vm8, %v360_v57, -1e+30 }
 0x3dd   :  { %v369_v59 = vsel %vm365_vm7, %v364_v58, -inf }
 0x3de   :  { %370 = vmax.xlane.f32.xlu2 %v369_v59 }
 0x3ef   :  { %501 = vrot.lane.b32.xlu1 %v1856_v8, %s1765_s15 }
 0x3f6   :  { %523 = vrot.lane.b32.xlu2 %v521_v60, %s1768_s17 }
 0x3f7   :  { %484 = vrot.lane.b32.xlu1 %v482_v61, %s1768_s17 }
 0x449   :  { %v368_v62 = vpop.xlane.xlu1 %367 }
 0x44a   :  { %v372_v63 = vsub.f32 %v363_v52, %v368_v62 }
 0x44c   :  { %v374_v1 = vmul.f32 1.442695, %v372_v63 }
 0x44e   :  { %1577 = vpow2.f32 %v374_v1 }
 0x451   :  { %v371_v2 = vpop.xlane.xlu2 %370 }
 0x452   :  { %v373_v3 = vsub.f32 %v364_v58, %v371_v2 }
 0x454   :  { %v1578_v4 = vpop.eup %1577  ;;  %v376_v5 = vmul.f32 1.442695, %v373_v3 }
 0x455   :  { %v378_v6 = vsel %vm365_vm7, %v1578_v4, 0.0 }
 0x456   :  { %1579 = vpow2.f32 %v376_v5  ;;  %379 = vadd.xlane.f32.xlu0 %v378_v6 }
 0x459   :  { %v524_v7 = vpop.permute.xlu2 %523 }
 0x45a   :  { %v525_v10 = vsel %vm284_vm4, %v524_v7, %v521_v60 }
 0x45b   :  { %526 = vrot.lane.b32.xlu1 %v525_v10, %s1768_s17 }
 0x45c   :  { %v1580_v11 = vpop.eup %1579 }
 0x45d   :  { %v381_v12 = vsel %vm365_vm7, %v1580_v11, 0.0 }
 0x45e   :  { %382 = vadd.xlane.f32.xlu2 %v381_v12 }
 0x461   :  { %v502_v14 = vpop.permute.xlu1 %501 }
 0x463   :  { %516 = vrot.lane.b32.xlu1 %v1884_v21, %s1769_s18 }
 0x469   :  { %v485_v15 = vpop.permute.xlu1 %484 }
 0x46a   :  { %390 = vrot.lane.b32.xlu0 %v1938_v13, %s1765_s15  ;;  %v486_v16 = vsel %vm284_vm4, %v485_v15, %v482_v61 }
 0x46b   :  { %497 = vrot.lane.b32.xlu1 %v1884_v21, %s1765_s15 }
 0x476   :  { %504 = vrot.lane.b32.xlu2 %v502_v14, %s1768_s17 }
 0x47e   :  { %487 = vrot.lane.b32.xlu2 %v486_v16, %s1768_s17 }
 0x4c9   :  { %v380_v22 = vpop.xlane.xlu0 %379 }
 0x4cd   :  { %v527_v17 = vpop.permute.xlu1 %526 }
 0x4ce   :  { %v528_v18 = vsel %vm284_vm4, %v527_v17, %v521_v60 }
 0x4cf   :  { %v529_v19 = vmul.f32 %v528_v18, %v1879_v20 }
 0x4d1   :  { %531 = vrot.lane.b32.xlu2 %v529_v19, %s1771_s1  ;;  %v383_v23 = vpop.xlane.xlu2 %382  ;;  %s1155_s1 = sshll.u32 %s2036_s9, 4  ;;  %s1156_s1 = int_to_ptr.hbm [resolvable:$true] %s1155_s1 }
 0x4d2   :  { %1581 = vrcp.f32 %v383_v23 }
 0x4d3   :  { %1583 = vrcp.f32 %v380_v22 }
 0x4d5   :  { %v517_v36 = vpop.permute.xlu1 %516 }
 0x4d6   :  { %v519_v37 = vmul.f32 %v517_v36, %v1856_v8 }
 0x4d8   :  { %v1582_v21 = vpop.eup %1581 }
 0x4d9   :  { %v505_v24 = vpop.permute.xlu2 %504  ;;  %v1584_v25 = vpop.eup %1583  ;;  %v387_v27 = vmul.f32 %v1582_v21, %v1580_v11 }
 0x4da   :  { %v506_v26 = vsel %vm284_vm4, %v505_v24, %v502_v14  ;;  %v386_v29 = vmul.f32 %v1584_v25, %v1578_v4  ;;  %v1504_v25 = vld [vmem:[%s2033_s6 + $0x38] sm:$0xff] }
 0x4db   :  { %507 = vrot.lane.b32.xlu0 %v506_v26, %s1768_s17 }
 0x4dc   :  { %v391_v28 = vpop.permute.xlu0 %390  ;;  %v388_v32 = vpack.c.bf16 %v387_v27, %v386_v29 }
 0x4dd   :  { %v397_v30 = vsel %vm395_vm9, %v391_v28, 0  ;;  %v498_v58 = vpop.permute.xlu1 %497 }
 0x4de   :  { %406 = vmatpush.bf16.msrb.mxu1 %v397_v30 }
 0x4e1   :  { %1248 = vmatmul.msk.bf16.vlgmr.msrb.gmra.mxu1 %vm365_vm7, %v388_v32  ;;  %v488_v33 = vpop.permute.xlu2 %487 }
 0x4e2   :  { %v489_v34 = vsel %vm284_vm4, %v488_v33, %v482_v61  ;;  %673 = vmatpush.bf16.msra.mxu1 %v1504_v25  ;;  %v1361_v25 = vld [vmem:[#allocation7 + $0x88] sm:$0xf] }
 0x4e3   :  { %v490_v35 = vmul.f32 %v489_v34, %v1879_v20  ;;  %v1501_v34 = vld [vmem:[%s2033_s6 + $0x20] sm:$0xff] }
 0x4e5   :  { %492 = vrot.lane.b32.xlu0 %v490_v35, %s1763_s12  ;;  %v1503_v35 = vld [vmem:[%s2033_s6 + $0x30] sm:$0xff] }
 0x4e6   :  { %674 = vmatpush.bf16.msra.mxu1 %v1503_v35  ;;  %v1517_v35 = vld [vmem:[#allocation7 + $0x64] sm:$0xf] }
 0x52b   :  { %v532_v38 = vpop.permute.xlu2 %531 }
 0x52c   :  { %v534_v39 = vadd.f32 %v532_v38, %v519_v37 }
 0x52e   :  { %536 = vrot.lane.b32.xlu0 %v534_v39, %s1769_s18 }
 0x54d   :  { %v508_v44 = vpop.permute.xlu0 %507 }
 0x54e   :  { %v509_v45 = vsel %vm284_vm4, %v508_v44, %v502_v14  ;;  %v1403_v44 = vld [vmem:[#allocation7 + $0xf0] sm:$0xf0] }
 0x54f   :  { %v510_v46 = vmul.f32 %v509_v45, %v1879_v20  ;;  %v500_v20 = vmul.f32 %v498_v58, %v1856_v8  ;;  %v1409_v45 = vld [vmem:[#allocation7 + $0xe8] sm:$0xf] }
 0x551   :  { %512 = vrot.lane.b32.xlu2 %v510_v46, %s1772_s29  ;;  %v1536_v46 = vld [vmem:[#allocation7 + $0xf4] sm:$0xf0] }
 0x557   :  { %v493_v48 = vpop.permute.xlu0 %492 }
 0x558   :  { %v495_v50 = vadd.f32 %v493_v48, %v479_v47  ;;  %v1406_v47 = vor.u32 %v1533_v42, %v1403_v44  ;;  %v1410_v48 = vor.u32 %v1536_v46, %v1409_v45  ;;  %v1518_v42 = vld [vmem:[#allocation7 + $0x6c] sm:$0xf]  ;;  %v1321_v45 = vld [vmem:[#allocation7 + $0x40] sm:$0xf]  ;;  %v1515_v46 = vld [vmem:[#allocation7 + $0x4c] sm:$0xf0] }
 0x55a   :  { %v496_v51 = vpack.c.bf16 %v495_v50, %v495_v50  ;;  %v1534_v50 = vld [vmem:[#allocation7 + $0xec] sm:$0xf] }
 0x55c   :  { %544 = vrot.lane.b32.xlu1 %v496_v51, %s1769_s18  ;;  %v1411_v51 = vld [vmem:[#allocation7 + $0xf8] sm:$0xf0] }
 0x55e   :  { %v408_v52 = vpop.f32.mrf.mxu1 }
 0x55f   :  { %v413_v53 = vpack.c.bf16 %v408_v52, %v408_v52  ;;  %v1414_v52 = vor.u32 %v1534_v50, %v1411_v51  ;;  %v1323_v50 = vld [vmem:[#allocation7 + $0x50] sm:$0xf0]  ;;  %v1329_v51 = vld [vmem:[#allocation7 + $0x48] sm:$0xf] }
 0x561   :  { %1266 = vmatmul.msk.bf16.vlgmr.msra.gmra.mxu2 %vm342_vm5, %v413_v53  ;;  %936 = vmatpush.bf16.msrb.mxu1 %v1414_v52  ;;  %v1516_v52 = vld [vmem:[#allocation7 + $0x54] sm:$0xf0] }
 0x566   :  { %v410_v54 = vpop.f32.mrf.mxu1 }
 0x567   :  { %v418_v57 = vpack.c.bf16 %v410_v54, %v410_v54 }
 0x569   :  { %1257 = vmatmul.msk.bf16.vlgmr.msra.gmra.mxu3 %vm342_vm5, %v418_v57 }
 0x5a0   :  { %v537_v61 = vpop.permute.xlu0 %536 }
 0x5ab   :  { %v513_v59 = vpop.permute.xlu2 %512 }
 0x5ac   :  { %v515_v60 = vadd.f32 %v513_v59, %v500_v20 }
 0x5ae   :  { %v539_v9 = vpack.c.bf16 %v537_v61, %v515_v60 }
 0x5b0   :  { %541 = vrot.lane.b32.xlu2 %v539_v9, %s1765_s15  ;;  %v1385_v9 = vld [vmem:[#allocation7 + $0xc0] sm:$0xf] }
 0x5ce   :  { %v545_v31 = vpop.permute.xlu1 %544 }
 0x5cf   :  { %v550_v62 = vsel %vm342_vm5, %v545_v31, 0  ;;  %v1531_v31 = vld [vmem:[#allocation7 + $0xcc] sm:$0xf0] }
 0x5d0   :  { %559 = vmatpush.bf16.xpose.msrb.mxu3 %v550_v62  ;;  %v1529_v62 = vld [vmem:[#allocation7 + $0xc4] sm:$0xf] }
 0x5d8   :  { %897 = vmatpush.bf16.msra.mxu3 %v1402_v43  ;;  %v1347_v43 = vld [vmem:[#allocation7 + $0x78] sm:$0xf0] }
 0x5d9   :  { %v1350_v44 = vor.u32 %v1518_v42, %v1347_v43  ;;  %v1547_v42 = vld [vmem:[#allocation8 + $0x50] sm:$0xff] }
 0x5e4   :  { %v475_v63 = vpop.f32.mrf.mxu2 }
 0x5ec   :  { %v447_v1 = vpop.f32.mrf.mxu3  ;;  %v477_v2 = vpop.f32.mrf.mxu2 }
 0x5ed   :  { %v1980_v3 = vadd.f32 %v475_v63, %v447_v1  ;;  %v1386_v63 = vor.u32 %v1531_v31, %v1385_v9  ;;  %v1387_v1 = vld [vmem:[#allocation7 + $0xd0] sm:$0xf0]  ;;  %v1393_v2 = vld [vmem:[#allocation7 + $0xc8] sm:$0xf]  ;;  %v1509_v9 = vld [vmem:[#allocation7 + $0x24] sm:$0xf] }
 0x5ef   :  { %898 = vmatpush.bf16.msra.mxu3 %v1386_v63  ;;  %v1313_v63 = vld [vmem:[#allocation7 + $0x28] sm:$0xf] }
 0x5f4   :  { %v449_v4 = vpop.f32.mrf.mxu3 }
 0x5f5   :  { %v1390_v4 = vor.u32 %v1529_v62, %v1387_v1  ;;  %v1307_v62 = vld [vmem:[#allocation7 + $0x30] sm:$0xf0]  ;;  %v1512_v1 = vld [vmem:[#allocation7 + $0x34] sm:$0xf0] }
 0x60a   :  { %v542_v5 = vpop.permute.xlu2 %541 }
 0x60b   :  { %1267 = vmatmul.msk.bf16.vlgmr.msrb.gmra.mxu3 %vm342_vm5, %v542_v5 }
 0x68e   :  { %v561_v8 = vpop.f32.mrf.mxu3 }
 0x68f   :  { %v566_v6 = vsel %vm1912_vm6, %v561_v8, -1e+30  ;;  %v1530_v8 = vld [vmem:[#allocation7 + $0xcc] sm:$0xf] }
 0x690   :  { %v568_v7 = vsel %vm365_vm7, %v566_v6, -inf }
 0x691   :  { %569 = vmax.xlane.f32.xlu0 %v568_v7  ;;  %v1369_v7 = vld [vmem:[#allocation7 + $0xa0] sm:$0xf] }
 0x696   :  { %v563_v10 = vpop.f32.mrf.mxu3 }
 0x697   :  { %v567_v11 = vsel %vm1919_vm8, %v563_v10, -1e+30  ;;  %v1527_v10 = vld [vmem:[#allocation7 + $0xac] sm:$0xf0] }
 0x698   :  { %v571_v12 = vsel %vm365_vm7, %v567_v11, -inf }
 0x699   :  { %572 = vmax.xlane.f32.xlu1 %v571_v12  ;;  %v1370_v12 = vor.u32 %v1527_v10, %v1369_v7  ;;  %v1505_v7 = vld [vmem:[#allocation7 + $0x4] sm:$0xf] }
 0x69b   :  { %899 = vmatpush.bf16.msra.mxu3 %v1370_v12  ;;  %v1297_v12 = vld [vmem:[#allocation7 + $0x8] sm:$0xf] }
 0x6b2   :  { %591 = vrot.lane.b32.xlu1 %v1938_v13, %s1768_s17  ;;  %v1502_v13 = vld [vmem:[%s2033_s6 + $0x28] sm:$0xff] }
 0x6b3   :  { %639 = vmatpush.bf16.msra.mxu0 %v1502_v13  ;;  %v1355_v13 = vld [vmem:[#allocation7 + $0x90] sm:$0xf0] }
 0x6b7   :  { %640 = vmatpush.bf16.msra.mxu0 %v1501_v34  ;;  %v1519_v34 = vld [vmem:[#allocation7 + $0x6c] sm:$0xf0] }
 0x6bb   :  { %923 = vmatpush.bf16.msrb.mxu0 %v1410_v48  ;;  %v1322_v48 = vor.u32 %v1515_v46, %v1321_v45  ;;  %v1538_v45 = vld [vmem:[#allocation8 + $0x8] sm:$0xff] }
 0x6bc   :  { %v1546_v46 = vld [vmem:[#allocation8 + $0x48] sm:$0xff] }
 0x704   :  { %v570_v14 = vpop.xlane.xlu0 %569 }
 0x705   :  { %v574_v15 = vsub.f32 %v566_v6, %v570_v14  ;;  %v1395_v6 = vld [vmem:[#allocation7 + $0xd8] sm:$0xf0]  ;;  %v1371_v14 = vld [vmem:[#allocation7 + $0xb0] sm:$0xf0] }
 0x707   :  { %v576_v16 = vmul.f32 1.442695, %v574_v15  ;;  %v1377_v15 = vld [vmem:[#allocation7 + $0xa8] sm:$0xf] }
 0x709   :  { %1585 = vpow2.f32 %v576_v16  ;;  %v1528_v16 = vld [vmem:[#allocation7 + $0xb4] sm:$0xf0] }
 0x70c   :  { %v573_v17 = vpop.xlane.xlu1 %572 }
 0x70d   :  { %v575_v49 = vsub.f32 %v567_v11, %v573_v17  ;;  %v1525_v11 = vld [vmem:[#allocation7 + $0xa4] sm:$0xf] }
 0x70e   :  { %v1374_v17 = vor.u32 %v1525_v11, %v1371_v14  ;;  %v1291_v11 = vld [vmem:[#allocation7 + $0x10] sm:$0xf0]  ;;  %v1508_v14 = vld [vmem:[#allocation7 + $0x14] sm:$0xf0] }
 0x70f   :  { %v1586_v18 = vpop.eup %1585  ;;  %v578_v19 = vmul.f32 1.442695, %v575_v49  ;;  %v1378_v49 = vor.u32 %v1528_v16, %v1377_v15  ;;  %v1294_v15 = vor.u32 %v1505_v7, %v1291_v11  ;;  %v1298_v16 = vor.u32 %v1508_v14, %v1297_v12 }
 0x710   :  { %v580_v22 = vsel %vm365_vm7, %v1586_v18, 0.0 }
 0x711   :  { %1587 = vpow2.f32 %v578_v19  ;;  %581 = vadd.xlane.f32.xlu2 %v580_v22  ;;  %v1379_v19 = vld [vmem:[#allocation7 + $0xb8] sm:$0xf0] }
 0x717   :  { %v1588_v55 = vpop.eup %1587 }
 0x718   :  { %v583_v23 = vsel %vm365_vm7, %v1588_v55, 0.0 }
 0x719   :  { %584 = vadd.xlane.f32.xlu0 %v583_v23  ;;  %v1523_v23 = vld [vmem:[#allocation7 + $0x8c] sm:$0xf0] }
 0x724   :  { %v592_v21 = vpop.permute.xlu1 %591 }
 0x725   :  { %v597_v24 = vsel %vm395_vm9, %v592_v21, 0  ;;  %v1521_v21 = vld [vmem:[#allocation7 + $0x84] sm:$0xf] }
 0x726   :  { %606 = vmatpush.bf16.msrb.mxu2 %v597_v24 }
 0x72a   :  { %910 = vmatpush.bf16.msra.mxu2 %v1406_v47  ;;  %v1513_v47 = vld [vmem:[#allocation7 + $0x44] sm:$0xf] }
 0x72e   :  { %911 = vmatpush.bf16.msra.mxu2 %v1390_v4  ;;  %v1510_v4 = vld [vmem:[#allocation7 + $0x2c] sm:$0xf] }
 0x732   :  { %912 = vmatpush.bf16.msra.mxu2 %v1374_v17  ;;  %v1506_v17 = vld [vmem:[#allocation7 + $0xc] sm:$0xf] }
 0x784   :  { %v582_v26 = vpop.xlane.xlu2 %581 }
 0x785   :  { %1589 = vrcp.f32 %v582_v26  ;;  %v1524_v26 = vld [vmem:[#allocation7 + $0x94] sm:$0xf0] }
 0x78b   :  { %v1590_v28 = vpop.eup %1589 }
 0x78c   :  { %v585_v27 = vpop.xlane.xlu0 %584  ;;  %v588_v30 = vmul.f32 %v1590_v28, %v1586_v18  ;;  %v1526_v18 = vld [vmem:[#allocation7 + $0xac] sm:$0xf]  ;;  %v1362_v28 = vor.u32 %v1524_v26, %v1361_v25 }
 0x78d   :  { %1591 = vrcp.f32 %v585_v27  ;;  %v1382_v22 = vor.u32 %v1526_v18, %v1379_v19  ;;  %v1358_v27 = vor.u32 %v1521_v21, %v1355_v13 }
 0x78f   :  { %913 = vmatpush.bf16.msra.mxu2 %v1358_v27  ;;  %v1572_v27 = vld [vmem:[%s2031_s4] ss:$0 sm:$0xff]  ;;  %s1773_s4 = smov [#allocation11]  }
 0x790   :  { %s1164_s16 = sshll.u32 %s1773_s4, 4  ;;  %s1165_s16 = int_to_ptr.vmem [resolvable:$true] %s1164_s16 }
 0x793   :  { %v1592_v29 = vpop.eup %1591 }
 0x794   :  { %v589_v32 = vmul.f32 %v1592_v29, %v1588_v55  ;;  %v1353_v55 = vld [vmem:[#allocation7 + $0x80] sm:$0xf]  ;;  %v1522_v29 = vld [vmem:[#allocation7 + $0x8c] sm:$0xf] }
 0x795   :  { %v1354_v24 = vor.u32 %v1523_v23, %v1353_v55 }
 0x796   :  { %v590_v33 = vpack.c.bf16 %v589_v32, %v588_v30  ;;  %v1363_v30 = vld [vmem:[#allocation7 + $0x98] sm:$0xf0] }
 0x797   :  { %900 = vmatpush.bf16.msra.mxu3 %v1354_v24  ;;  %v1366_v32 = vor.u32 %v1522_v29, %v1363_v30 }
 0x798   :  { %1268 = vmatmul.msk.bf16.vlgmr.msrb.gmra.mxu2 %vm365_vm7, %v590_v33  ;;  %v1337_v33 = vld [vmem:[#allocation7 + $0x60] sm:$0xf] }
 0x81b   :  { %v608_v36 = vpop.f32.mrf.mxu2 }
 0x81c   :  { %v613_v37 = vpack.c.bf16 %v608_v36, %v608_v36  ;;  %v1338_v36 = vor.u32 %v1519_v34, %v1337_v33  ;;  %v1552_v33 = vld [vmem:[#allocation8 + $0x78] sm:$0xff]  ;;  %v1543_v34 = vld [vmem:[#allocation8 + $0x30] sm:$0xff] }
 0x81e   :  { %1277 = vmatmul.msk.bf16.vlgmr.msra.gmra.mxu0 %vm342_vm5, %v613_v37  ;;  %v1339_v37 = vld [vmem:[#allocation7 + $0x70] sm:$0xf0]  ;;  %901 = vmatpush.bf16.msra.mxu3 %v1338_v36  ;;  %v1542_v36 = vld [vmem:[#allocation8 + $0x28] sm:$0xff] }
 0x81f   :  { %v1342_v40 = vor.u32 %v1517_v35, %v1339_v37  ;;  %v1551_v35 = vld [vmem:[#allocation8 + $0x70] sm:$0xff]  ;;  %v1550_v37 = vld [vmem:[#allocation8 + $0x68] sm:$0xff] }
 0x821   :  { %914 = vmatpush.bf16.msra.mxu2 %v1342_v40  ;;  %v1548_v40 = vld [vmem:[#allocation8 + $0x58] sm:$0xff] }
 0x822   :  { %902 = vmatpush.bf16.msra.mxu3 %v1322_v48  ;;  %v1545_v48 = vld [vmem:[#allocation8 + $0x40] sm:$0xff] }
 0x823   :  { %v610_v38 = vpop.f32.mrf.mxu2 }
 0x824   :  { %v647_v39 = vpack.c.bf16 %v610_v38, %v610_v38  ;;  %v1345_v38 = vld [vmem:[#allocation7 + $0x68] sm:$0xf] }
 0x826   :  { %1286 = vmatmul.msk.bf16.vlgmr.msra.gmra.mxu1 %vm342_vm5, %v647_v39  ;;  %v1520_v39 = vld [vmem:[#allocation7 + $0x74] sm:$0xf0] }
 0x827   :  { %v1346_v41 = vor.u32 %v1520_v39, %v1345_v38  ;;  %v1541_v38 = vld [vmem:[#allocation8 + $0x20] sm:$0xff]  ;;  %v1540_v39 = vld [vmem:[#allocation8 + $0x18] sm:$0xff] }
 0x89b   :  { %v642_v53 = vpop.f32.mrf.mxu0 }
 0x89c   :  { %v646_v54 = vadd.f32 %v642_v53, %v1980_v3  ;;  %v1532_v3 = vld [vmem:[#allocation7 + $0xd4] sm:$0xf0]  ;;  %v1326_v53 = vor.u32 %v1513_v47, %v1323_v50  ;;  %v1537_v47 = vld [vmem:[#allocation8] sm:$0xff] }
 0x89d   :  { %v1394_v5 = vor.u32 %v1532_v3, %v1393_v2  ;;  %v1310_v2 = vor.u32 %v1509_v9, %v1307_v62  ;;  %v1314_v3 = vor.u32 %v1512_v1, %v1313_v63 }
 0x89e   :  { %915 = vmatpush.bf16.msra.mxu2 %v1326_v53 }
 0x89f   :  { %924 = vmatpush.bf16.msrb.mxu0 %v1394_v5  ;;  %v1315_v5 = vld [vmem:[#allocation7 + $0x38] sm:$0xf0] }
 0x8a2   :  { %916 = vmatpush.bf16.msra.mxu2 %v1310_v2 }
 0x8a3   :  { %v644_v57 = vpop.f32.mrf.mxu0  ;;  %v676_v58 = vpop.f32.mrf.mxu1  ;;  %925 = vmatpush.bf16.msrb.mxu0 %v1378_v49  ;;  %v1299_v49 = vld [vmem:[#allocation7 + $0x18] sm:$0xf0] }
 0x8a4   :  { %v680_v20 = vadd.f32 %v676_v58, %v646_v54  ;;  %v1330_v54 = vor.u32 %v1516_v52, %v1329_v51  ;;  %v1514_v57 = vld [vmem:[#allocation7 + $0x4c] sm:$0xf]  ;;  %v1331_v58 = vld [vmem:[#allocation7 + $0x58] sm:$0xf0]  ;;  %v1302_v18 = vor.u32 %v1506_v17, %v1299_v49 }
 0x8a6   :  { %v2011_v59 = vadd.f32 %v680_v20, %v1845_v0  ;;  %v1398_v0 = vor.u32 %v1530_v8, %v1395_v6  ;;  %v1334_v20 = vor.u32 %v1514_v57, %v1331_v58  ;;  %v1318_v8 = vor.u32 %v1510_v4, %v1315_v5  ;;  %v1289_v6 = vld [vmem:[#allocation7] sm:$0xf]  ;;  %917 = vmatpush.bf16.msra.mxu2 %v1294_v15 }
 0x8a7   :  { %926 = vmatpush.bf16.msrb.mxu0 %v1362_v28 }
 0x8a8   :  { %682 = vst [vmem:[#allocation11] sm:$0xff] %v2011_v59  ;;  %v683_v60 = vmul.f32 %v2011_v59, %v2011_v59  ;;  %937 = vmatpush.bf16.msrb.mxu1 %v1398_v0  ;;  %v1507_v0 = vld [vmem:[#allocation7 + $0xc] sm:$0xf0] }
 0x8a9   :  { %v1290_v10 = vor.u32 %v1507_v0, %v1289_v6  ;;  %1169 = dma.vmem_to_hbm [thread:$0]  %s1165_s16, 128, %s1167_s3, [#allocation12]  }
 0x8aa   :  { %684 = vadd.xlane.f32.xlu2 %v683_v60  ;;  %v1305_v60 = vld [vmem:[#allocation7 + $0x20] sm:$0xf]  ;;  %1134 = vmatpush.bf16.msrb.mxu2 %v1552_v33 }
 0x8ab   :  { %v678_v61 = vpop.f32.mrf.mxu1  ;;  %927 = vmatpush.bf16.msrb.mxu0 %v1346_v41  ;;  %v1539_v41 = vld [vmem:[#allocation8 + $0x10] sm:$0xff] }
 0x8ac   :  { %938 = vmatpush.bf16.msrb.mxu1 %v1382_v22  ;;  %v1511_v61 = vld [vmem:[#allocation7 + $0x2c] sm:$0xf0] }
 0x8ad   :  { %v1306_v31 = vor.u32 %v1511_v61, %v1305_v60 }
 0x8ae   :  { %1135 = vmatpush.bf16.msrb.mxu2 %v1551_v35 }
 0x8af   :  { %928 = vmatpush.bf16.msrb.mxu0 %v1330_v54  ;;  %903 = vmatpush.bf16.msra.mxu3 %v1306_v31 }
 0x8b0   :  { %939 = vmatpush.bf16.msrb.mxu1 %v1366_v32  ;;  %v1544_v32 = vld [vmem:[#allocation8 + $0x38] sm:$0xff] }
 0x8b2   :  { %1136 = vmatpush.bf16.msrb.mxu2 %v1550_v37 }
 0x8b3   :  { %929 = vmatpush.bf16.msrb.mxu0 %v1314_v3  ;;  %904 = vmatpush.bf16.msra.mxu3 %v1290_v10 }
 0x8b4   :  { %940 = vmatpush.bf16.msrb.mxu1 %v1350_v44 }
 0x8b7   :  { %930 = vmatpush.bf16.msrb.mxu0 %v1298_v16  ;;  %1121 = vmatpush.bf16.msrb.mxu3 %v1544_v32 }
 0x8b8   :  { %941 = vmatpush.bf16.msrb.mxu1 %v1334_v20 }
 0x8bb   :  { %1122 = vmatpush.bf16.msrb.mxu3 %v1543_v34 }
 0x8bc   :  { %942 = vmatpush.bf16.msrb.mxu1 %v1318_v8 }
 0x8bf   :  { %1123 = vmatpush.bf16.msrb.mxu3 %v1542_v36 }
 0x8c0   :  { %943 = vmatpush.bf16.msrb.mxu1 %v1302_v18 }
 0x8c3   :  { %1124 = vmatpush.bf16.msrb.mxu3 %v1541_v38 }
 0x8c7   :  { %1125 = vmatpush.bf16.msrb.mxu3 %v1540_v39 }
 0x8cb   :  { %1126 = vmatpush.bf16.msrb.mxu3 %v1539_v41 }
 0x8cf   :  { %1127 = vmatpush.bf16.msrb.mxu3 %v1538_v45 }
 0x8d3   :  { %1128 = vmatpush.bf16.msrb.mxu3 %v1537_v47 }
 0x91d   :  { %v685_v19 = vpop.xlane.xlu2 %684 }
 0x91e   :  { %v686_v22 = vmul.f32 %v685_v19, %v1849_v56 }
 0x920   :  { %v687_v55 = vadd.f32 1e-05, %v686_v22 }
 0x922   :  { %1593 = vrsqrt.f32 %v687_v55  ;;  %vm694_vm11 = vweird.f32 %v687_v55 }
 0x928   :  { %v1594_v23 = vpop.eup %1593 }
 0x929   :  { %v689_v21 = vmul.f32 %v1594_v23, %v687_v55  ;;  %vm695_vm10 = vweird.f32 %v1594_v23 }
 0x92a   :  { %vm696_vm12 = vmor %vm694_vm11, %vm695_vm10 }
 0x92b   :  { %v690_v24 = vmul.f32 %v1594_v23, %v689_v21 }
 0x92d   :  { %v691_v13 = vmul.f32 0.5, %v690_v24 }
 0x92f   :  { %v692_v25 = vsub.f32 1.5, %v691_v13 }
 0x931   :  { %v693_v26 = vmul.f32 %v1594_v23, %v692_v25 }
 0x933   :  { %v697_v28 = vsel %vm696_vm12, %v1594_v23, %v693_v26 }
 0x934   :  { %v698_v29 = vmul.f32 %v697_v28, %v2011_v59  ;;  %v1549_v59 = vld [vmem:[#allocation8 + $0x60] sm:$0xff] }
 0x935   :  { %1137 = vmatpush.bf16.msrb.mxu2 %v1549_v59 }
 0x936   :  { %v703_v30 = vmul.f32 %v1572_v27, %v698_v29 }
 0x938   :  { %v704_v56 = vpack.c.bf16 %v703_v30, %v703_v30 }
 0x939   :  { %1138 = vmatpush.bf16.msrb.mxu2 %v1548_v40 }
 0x93a   :  { %905 = vmatmul.bf16.vlgmr.msra.gmra.mxu3 %v704_v56  ;;  %918 = vmatmul.bf16.vlgmr.msra.gmra.mxu2 %v704_v56 }
 0x93b   :  { %931 = vmatmul.bf16.vlgmr.msrb.gmra.mxu0 %v704_v56  ;;  %944 = vmatmul.bf16.vlgmr.msrb.gmra.mxu1 %v704_v56 }
 0x93d   :  { %1139 = vmatpush.bf16.msrb.mxu2 %v1547_v42 }
 0x941   :  { %1140 = vmatpush.bf16.msrb.mxu2 %v1546_v46 }
 0x945   :  { %1141 = vmatpush.bf16.msrb.mxu2 %v1545_v48 }
 0x9b8   :  { %v932_v43 = vpop.f32.mrf.mxu0  ;;  %v945_v44 = vpop.f32.mrf.mxu1 }
 0x9bd   :  { %v906_v50 = vpop.f32.mrf.mxu3  ;;  %v919_v51 = vpop.f32.mrf.mxu2 }
 0x9be   :  { %v1415_v52 = vmul.f32 -1.442695, %v906_v50  ;;  %v1416_v53 = vmul.f32 -1.442695, %v919_v51 }
 0x9c0   :  { %1595 = vpow2.f32 %v1415_v52  ;;  %v934_v54 = vpop.f32.mrf.mxu0  ;;  %v947_v57 = vpop.f32.mrf.mxu1 }
 0x9c1   :  { %1597 = vpow2.f32 %v1416_v53 }
 0x9c5   :  { %v908_v58 = vpop.f32.mrf.mxu3  ;;  %v921_v20 = vpop.f32.mrf.mxu2 }
 0x9c6   :  { %v1596_v60 = vpop.eup %1595 }
 0x9c7   :  { %v1598_v61 = vpop.eup %1597  ;;  %v955_v9 = vadd.f32 1.0, %v1596_v60 }
 0x9c8   :  { %v956_v31 = vadd.f32 1.0, %v1598_v61 }
 0x9c9   :  { %1599 = vrcp.f32 %v955_v9  ;;  %v968_v4 = vand.u32 2147483648, %v955_v9  ;;  %v966_v6 = vand.u32 2147483647, %v955_v9  ;;  %vm962_vm15 = vweird.f32 %v955_v9 }
 0x9ca   :  { %1601 = vrcp.f32 %v956_v31  ;;  %v983_v0 = vand.u32 2147483648, %v956_v31  ;;  %v981_v10 = vand.u32 2147483647, %v956_v31  ;;  %vm977_vm1 = vweird.f32 %v956_v31 }
 0x9cb   :  { %v969_v12 = vor.u32 1.1754944e-38, %v968_v4  ;;  %vm967_vm2 = vcmp.eq.f32.partialorder %v966_v6, 8.507059e+37 }
 0x9cc   :  { %v984_v16 = vor.u32 1.1754944e-38, %v983_v0  ;;  %vm982_vm4 = vcmp.eq.f32.partialorder %v981_v10, 8.507059e+37 }
 0x9cf   :  { %v1600_v62 = vpop.eup %1599 }
 0x9d0   :  { %v1602_v63 = vpop.eup %1601  ;;  %v958_v1 = vmul.f32 %v1600_v62, %v955_v9  ;;  %vm963_vm13 = vweird.f32 %v1600_v62 }
 0x9d1   :  { %v973_v2 = vmul.f32 %v1602_v63, %v956_v31  ;;  %vm978_vm14 = vweird.f32 %v1602_v63  ;;  %vm964_vm0 = vmor %vm962_vm15, %vm963_vm13 }
 0x9d2   :  { %v959_v3 = vsub.f32 1.0, %v958_v1  ;;  %vm979_vm3 = vmor %vm977_vm1, %vm978_vm14 }
 0x9d3   :  { %v974_v5 = vsub.f32 1.0, %v973_v2 }
 0x9d4   :  { %v960_v8 = vmul.f32 %v1600_v62, %v959_v3 }
 0x9d5   :  { %v975_v7 = vmul.f32 %v1602_v63, %v974_v5 }
 0x9d6   :  { %v961_v11 = vadd.f32 %v1600_v62, %v960_v8 }
 0x9d7   :  { %v976_v14 = vadd.f32 %v1602_v63, %v975_v7 }
 0x9d8   :  { %v965_v15 = vsel %vm964_vm0, %v1600_v62, %v961_v11 }
 0x9d9   :  { %v970_v17 = vsel %vm967_vm2, %v969_v12, %v965_v15  ;;  %v980_v49 = vsel %vm979_vm3, %v1602_v63, %v976_v14 }
 0x9da   :  { %v987_v18 = vmul.f32 %v970_v17, %v906_v50  ;;  %v985_v19 = vsel %vm982_vm4, %v984_v16, %v980_v49 }
 0x9db   :  { %v988_v22 = vmul.f32 %v985_v19, %v919_v51 }
 0x9dc   :  { %v989_v55 = vmul.f32 %v987_v18, %v932_v43 }
 0x9dd   :  { %v990_v23 = vmul.f32 %v988_v22, %v945_v44 }
 0x9de   :  { %v991_v21 = vpack.c.bf16 %v989_v55, %v989_v55 }
 0x9df   :  { %v992_v24 = vpack.c.bf16 %v990_v23, %v990_v23 }
 0x9e0   :  { %1129 = vmatmul.bf16.vlgmr.msrb.gmra.mxu3 %v991_v21 }
 0x9e1   :  { %1142 = vmatmul.bf16.vlgmr.msrb.gmra.mxu2 %v992_v24 }
 0xa63   :  { %v1130_v13 = vpop.f32.mrf.mxu3 }
 0xa64   :  { %v1143_v25 = vpop.f32.mrf.mxu2 }
 0xa65   :  { %v1144_v26 = vadd.f32 %v1143_v25, %v1130_v13 }
 0xa67   :  { %1147 = vst [vmem:[#allocation10] sm:$0xff] %v1144_v26 }
 0xa68   :  { %1158 = dma.vmem_to_hbm [thread:$0]  %s1154_s2, 128, %s1156_s1, [#allocation4]  }
 0xa6b   :  { %v1132_v27 = vpop.f32.mrf.mxu3 }
 0xa6c   :  { %v1145_v28 = vpop.f32.mrf.mxu2 }
 0xa6d   :  { %1753 = dma.done.wait [#allocation4], 128  }
 0xa6e   :  { %1754 = vsyncadd [#allocation4], 4294967168 }
 0xa6f   :  { %1755 = dma.done.wait [#allocation12], 128  }
 0xa70   :  { %1756 = vsyncadd [#allocation12], 4294967168 }
 0xa71   :  { %1178 = vsyncpa [#allocation3], 1 }
 0xa72   :  { %1179 = vsyncpa [#allocation6], 1 }
 0xa73   :  { %1180 = vsyncpa [#allocation9], 1 }
 0xa74   :  { %1181 = vsyncpa [#allocation4], 1 }
 0xa75   :  { %1182 = vsyncpa [#allocation12], 1 }

</bundles_post_ra>
